<compile_context>
chip_gen: v7x
topology: tpu7x:2x2x1
jax: 0.10.0
libtpu: 0.0.40
codegen_flags: <defaults>
</compile_context>

<pallas_src>
import functools

import jax
import jax.numpy as jnp
from jax.experimental import pallas as pl
from jax.experimental.pallas import tpu as pltpu


# --------------------------------------------------------------------------
# Fused kernel: Conv3x3 + folded BN + ReLU + global-avg-pool + 1x1 conv +
#               folded BN + sigmoid + scale, one batch item per grid step.
# --------------------------------------------------------------------------


def _arm_fused_kernel(x_ref, wt_ref, b1_ref, wat_ref, b2_ref, out_ref, *,
                      h, w, cin, cout):
    # x_ref  : (H+2, W+2, Cin)  bf16  padded NHWC image of this batch item
    # wt_ref : (Cout, 9*Cin)    bf16  conv weight, BN1 scale folded, transposed
    # b1_ref : (Cout, 1)        f32   folded BN1 bias
    # wat_ref: (Cout, Cout)     f32   (W_atten * bn_atten_scale)^T
    # b2_ref : (Cout, 1)        f32   folded bn_atten bias
    # out_ref: (Cout, H*W)      f32   final output (lane-dense, NCHW-flat)
    hw = h * w

    # Load the padded image once; all 9 tap shifts are static in-register
    # slices (XLU/VPU work) instead of repeated overlapping VMEM loads.
    img = x_ref[...]                                      # (H+2, W+2, Cin) bf16

    parts = []
    for kh in range(3):
        for kw in range(3):
            part = img[kh:kh + h, kw:kw + w, :]           # (H, W, Cin) static slice
            parts.append(part.reshape(hw, cin))
    slab = jnp.concatenate(parts, axis=1)                 # (H*W, 9*Cin) im2col, bf16

    # Single deep-K MXU matmul (K = 9*Cin): (Cout, K) x (H*W, K)^T -> (Cout, H*W)
    acc = jax.lax.dot_general(
        wt_ref[...], slab,
        dimension_numbers=(((1,), (1,)), ((), ())),
        preferred_element_type=jnp.float32)               # (Cout, H*W) f32

    feat = jnp.maximum(acc + b1_ref[...], 0.0)            # folded BN1 + ReLU

    # Attention branch, once per batch item:
    #   global avg pool -> 1x1 conv (+ folded bn_atten) -> sigmoid
    avg = feat.sum(axis=1, keepdims=True) * (1.0 / hw)    # (Cout, 1)
    logits = jnp.dot(wat_ref[...], avg,
                     preferred_element_type=jnp.float32) + b2_ref[...]
    atten = jax.nn.sigmoid(logits)                        # (Cout, 1)

    out_ref[...] = feat * atten                           # lane-dense store


def attention_refinement_pallas(xp, w_t, b1_col, wat_t, b2_col, *,
                                n, h, w, cin, cout):
    hw = h * w
    kernel = functools.partial(_arm_fused_kernel, h=h, w=w, cin=cin, cout=cout)

    flops = n * (2 * hw * 9 * cin * cout + 2 * cout * cout + 2 * hw * cout)
    bytes_accessed = (xp.size * 2 + w_t.size * 2 + wat_t.size * 4
                      + b1_col.size * 4 + b2_col.size * 4 + n * cout * hw * 4)

    return pl.pallas_call(
        kernel,
        out_shape=jax.ShapeDtypeStruct((n, cout, hw), jnp.float32),
        grid_spec=pltpu.PrefetchScalarGridSpec(
            num_scalar_prefetch=0,
            grid=(n,),
            in_specs=[
                pl.BlockSpec((None, h + 2, w + 2, cin), lambda i: (i, 0, 0, 0)),
                pl.BlockSpec((cout, 9 * cin), lambda i: (0, 0)),
                pl.BlockSpec((cout, 1), lambda i: (0, 0)),
                pl.BlockSpec((cout, cout), lambda i: (0, 0)),
                pl.BlockSpec((cout, 1), lambda i: (0, 0)),
            ],
            out_specs=pl.BlockSpec((None, cout, hw), lambda i: (i, 0, 0)),
        ),
        compiler_params=pltpu.CompilerParams(
            dimension_semantics=("parallel",),          # batch -> both TCs on v7x
            vmem_limit_bytes=32 * 1024 * 1024),         # actual need is a few MiB
        cost_estimate=pl.CostEstimate(flops=flops,
                                      transcendentals=n * cout,
                                      bytes_accessed=bytes_accessed),
    )(xp, w_t, b1_col, wat_t, b2_col)


# ---------------- parameter init (deterministic, mirrors the PyTorch __init__) ---


def _fold_bn(key, cout):
    k_g, k_b, k_m, k_v = jax.random.split(key, 4)
    gamma = 1.0 + 0.1 * jax.random.normal(k_g, (cout,), jnp.float32)
    beta = 0.1 * jax.random.normal(k_b, (cout,), jnp.float32)
    running_mean = 0.1 * jax.random.normal(k_m, (cout,), jnp.float32)
    running_var = 1.0 + 0.1 * jnp.abs(jax.random.normal(k_v, (cout,), jnp.float32))
    eps = 1e-5
    # TODO(synk): PyTorch BN in train() mode uses batch statistics; we fold the
    # running stats (inference-mode BN) into a per-channel scale/bias.
    scale = gamma / jnp.sqrt(running_var + eps)
    bias = beta - running_mean * scale
    return scale, bias


def init_arm_params(key, in_chan, out_chan):
    k_w1, k_bn1, k_w2, k_bn2 = jax.random.split(key, 4)
    # kaiming_normal_(a=1): gain = sqrt(2/(1+1)) = 1, std = 1/sqrt(fan_in)
    std1 = (1.0 / (in_chan * 3 * 3)) ** 0.5
    w_conv = jax.random.normal(k_w1, (3, 3, in_chan, out_chan), jnp.float32) * std1
    scale1, bias1 = _fold_bn(k_bn1, out_chan)

    std2 = (1.0 / out_chan) ** 0.5
    # 1x1 conv (bias=False) stored as a (Cin, Cout) matmul matrix.
    w_atten = jax.random.normal(k_w2, (out_chan, out_chan), jnp.float32) * std2
    scale2, bias2 = _fold_bn(k_bn2, out_chan)

    return dict(conv=dict(w=w_conv, scale=scale1, bias=bias1),
                atten=dict(w=w_atten, scale=scale2, bias=bias2))


# ---------------- forward --------------------------------------------------------


@jax.jit
def attention_refinement_forward(params, x_nchw):
    n, cin, h, w = x_nchw.shape
    p = params
    cout = p["conv"]["bias"].shape[0]

    # TODO(synk): NCHW->NHWC + pad + bf16 cast of the (smaller, Cin-channel)
    # input is still a wrapper-level XLA pass; folding it into the kernel would
    # require an in-kernel transpose of a lane-sparse NCHW layout.
    x = jnp.transpose(x_nchw, (0, 2, 3, 1))
    xp = jnp.pad(x, ((0, 0), (1, 1), (1, 1), (0, 0))).astype(jnp.bfloat16)

    # Fold BN1 into the conv weight/bias; lay the weight out as (Cout, 9*Cin)
    # so the kernel's single deep-K matmul yields feat in (Cout, H*W) layout.
    w_folded = (p["conv"]["w"] * p["conv"]["scale"]).reshape(9 * cin, cout)
    w_t = jnp.transpose(w_folded).astype(jnp.bfloat16)             # (Cout, 9*Cin)
    b1_col = p["conv"]["bias"].reshape(cout, 1).astype(jnp.float32)

    # Fold bn_atten scale into the 1x1 conv weight; transpose so the kernel's
    # column-vector matmul  logits = Wt @ avg  equals  avg @ (W * scale).
    wat_t = jnp.transpose(
        p["atten"]["w"] * p["atten"]["scale"][None, :]).astype(jnp.float32)
    b2_col = p["atten"]["bias"].reshape(cout, 1).astype(jnp.float32)

    out_flat = attention_refinement_pallas(xp, w_t, b1_col, wat_t, b2_col,
                                           n=n, h=h, w=w, cin=cin, cout=cout)
    return out_flat.reshape(n, cout, h, w)       # free reshape: already NCHW


# ---------------- reference (pure JAX, f32) for sanity check ----------------------


def attention_refinement_reference(params, x_nchw):
    x = jnp.transpose(x_nchw, (0, 2, 3, 1))
    p = params
    feat = jax.lax.conv_general_dilated(
        x, p["conv"]["w"], (1, 1), [(1, 1), (1, 1)],
        dimension_numbers=("NHWC", "HWIO", "NHWC"))
    feat = jnp.maximum(feat * p["conv"]["scale"] + p["conv"]["bias"], 0.0)
    avg = feat.mean(axis=(1, 2))                                        # (N, C)
    logits = avg @ (p["atten"]["w"] * p["atten"]["scale"][None, :]) + p["atten"]["bias"]
    atten = jax.nn.sigmoid(logits)
    out = feat * atten[:, None, None, :]
    return jnp.transpose(out, (0, 3, 1, 2))


if __name__ == "__main__":
    key = jax.random.PRNGKey(0)
    k_param, k_x = jax.random.split(key)

    IN_CHAN, OUT_CHAN = 64, 128      # small, but Cout=128 keeps stores lane-dense
    params = init_arm_params(k_param, IN_CHAN, OUT_CHAN)

    # NCHW input like the PyTorch module: batch=2, 64 channels, 16x16 spatial.
    x = jax.random.normal(k_x, (2, IN_CHAN, 16, 16), jnp.float32)

    out = attention_refinement_forward(params, x)
    out = jax.block_until_ready(out)
    assert out.shape == (2, OUT_CHAN, 16, 16), out.shape

    ref = attention_refinement_reference(params, x)
    # bf16 MXU operands (f32 accumulation) => ~0.5% relative error vs the pure
    # f32 reference; 2e-2 comfortably covers that while still catching real bugs.
    max_err = float(jnp.max(jnp.abs(out - ref)))
    assert jnp.allclose(out, ref, rtol=2e-2, atol=2e-2), max_err

    print("KERNEL_OK")
</pallas_src>

<mosaic_0001>
module attributes {stable_mosaic.version = 11 : i64} {
  func.func @_arm_fused_kernel(%arg0: i32, %arg1: memref<1x18x18x64xbf16, #tpu.memory_space<vmem>>, %arg2: memref<128x576xbf16, #tpu.memory_space<vmem>>, %arg3: memref<128x1xf32, #tpu.memory_space<vmem>>, %arg4: memref<128x128xf32, #tpu.memory_space<vmem>>, %arg5: memref<128x1xf32, #tpu.memory_space<vmem>>, %arg6: memref<1x128x256xf32, #tpu.memory_space<vmem>>) attributes {dimension_semantics = [#tpu.dimension_semantics<parallel>], iteration_bounds = array<i64: 2>, scalar_prefetch = 0 : i64, scratch_operands = 0 : i64, tpu.core_type = #tpu.core_type<tc>, window_params = [{transform_indices = @transform_0, window_bounds = array<i64: 1, 18, 18, 64>}, {pipeline_mode = #tpu.pipeline_mode<synchronous>, transform_indices = @transform_1, window_bounds = array<i64: 128, 576>}, {pipeline_mode = #tpu.pipeline_mode<synchronous>, transform_indices = @transform_2, window_bounds = array<i64: 128, 1>}, {pipeline_mode = #tpu.pipeline_mode<synchronous>, transform_indices = @transform_3, window_bounds = array<i64: 128, 128>}, {pipeline_mode = #tpu.pipeline_mode<synchronous>, transform_indices = @transform_4, window_bounds = array<i64: 128, 1>}, {transform_indices = @transform_5, window_bounds = array<i64: 1, 128, 256>}]} {
    %c0 = arith.constant 0 : index
    %c0_0 = arith.constant 0 : index
    %c0_1 = arith.constant 0 : index
    %c0_2 = arith.constant 0 : index
    %0 = vector.load %arg1[%c0, %c0_0, %c0_1, %c0_2] : memref<1x18x18x64xbf16, #tpu.memory_space<vmem>>, vector<1x18x18x64xbf16>
    %1 = vector.shape_cast %0 : vector<1x18x18x64xbf16> to vector<18x18x64xbf16>
    %2 = vector.extract_strided_slice %1 {offsets = [0, 0, 0], sizes = [16, 16, 64], strides = [1, 1, 1]} : vector<18x18x64xbf16> to vector<16x16x64xbf16>
    %3 = vector.shape_cast %2 : vector<16x16x64xbf16> to vector<256x64xbf16>
    %4 = vector.extract_strided_slice %1 {offsets = [0, 1, 0], sizes = [16, 16, 64], strides = [1, 1, 1]} : vector<18x18x64xbf16> to vector<16x16x64xbf16>
    %5 = vector.shape_cast %4 : vector<16x16x64xbf16> to vector<256x64xbf16>
    %6 = vector.extract_strided_slice %1 {offsets = [0, 2, 0], sizes = [16, 16, 64], strides = [1, 1, 1]} : vector<18x18x64xbf16> to vector<16x16x64xbf16>
    %7 = vector.shape_cast %6 : vector<16x16x64xbf16> to vector<256x64xbf16>
    %8 = vector.extract_strided_slice %1 {offsets = [1, 0, 0], sizes = [16, 16, 64], strides = [1, 1, 1]} : vector<18x18x64xbf16> to vector<16x16x64xbf16>
    %9 = vector.shape_cast %8 : vector<16x16x64xbf16> to vector<256x64xbf16>
    %10 = vector.extract_strided_slice %1 {offsets = [1, 1, 0], sizes = [16, 16, 64], strides = [1, 1, 1]} : vector<18x18x64xbf16> to vector<16x16x64xbf16>
    %11 = vector.shape_cast %10 : vector<16x16x64xbf16> to vector<256x64xbf16>
    %12 = vector.extract_strided_slice %1 {offsets = [1, 2, 0], sizes = [16, 16, 64], strides = [1, 1, 1]} : vector<18x18x64xbf16> to vector<16x16x64xbf16>
    %13 = vector.shape_cast %12 : vector<16x16x64xbf16> to vector<256x64xbf16>
    %14 = vector.extract_strided_slice %1 {offsets = [2, 0, 0], sizes = [16, 16, 64], strides = [1, 1, 1]} : vector<18x18x64xbf16> to vector<16x16x64xbf16>
    %15 = vector.shape_cast %14 : vector<16x16x64xbf16> to vector<256x64xbf16>
    %16 = vector.extract_strided_slice %1 {offsets = [2, 1, 0], sizes = [16, 16, 64], strides = [1, 1, 1]} : vector<18x18x64xbf16> to vector<16x16x64xbf16>
    %17 = vector.shape_cast %16 : vector<16x16x64xbf16> to vector<256x64xbf16>
    %18 = vector.extract_strided_slice %1 {offsets = [2, 2, 0], sizes = [16, 16, 64], strides = [1, 1, 1]} : vector<18x18x64xbf16> to vector<16x16x64xbf16>
    %19 = vector.shape_cast %18 : vector<16x16x64xbf16> to vector<256x64xbf16>
    %20 = tpu.concatenate %3, %5, %7, %9, %11, %13, %15, %17, %19 in 1 : vector<256x64xbf16>, vector<256x64xbf16>, vector<256x64xbf16>, vector<256x64xbf16>, vector<256x64xbf16>, vector<256x64xbf16>, vector<256x64xbf16>, vector<256x64xbf16>, vector<256x64xbf16> -> vector<256x576xbf16>
    %c0_3 = arith.constant 0 : index
    %c0_4 = arith.constant 0 : index
    %21 = vector.load %arg2[%c0_3, %c0_4] : memref<128x576xbf16, #tpu.memory_space<vmem>>, vector<128x576xbf16>
    %cst = arith.constant dense<0.000000e+00> : vector<128x256xf32>
    %22 = tpu.matmul %21, %20, %cst {dimension_numbers = #tpu.dot_dimension_numbers<[1], [1], [0], [0], [0, 0, 1, 0], [], []>} : vector<128x576xbf16>, vector<256x576xbf16>, vector<128x256xf32> -> vector<128x256xf32>
    %c0_5 = arith.constant 0 : index
    %c0_6 = arith.constant 0 : index
    %23 = vector.load %arg3[%c0_5, %c0_6] : memref<128x1xf32, #tpu.memory_space<vmem>>, vector<128x1xf32>
    %24 = vector.broadcast %23 : vector<128x1xf32> to vector<128x256xf32>
    %25 = arith.addf %22, %24 : vector<128x256xf32>
    %cst_7 = arith.constant 0.000000e+00 : f32
    %26 = vector.broadcast %cst_7 : f32 to vector<128x256xf32>
    %27 = arith.maximumf %25, %26 : vector<128x256xf32>
    %cst_8 = arith.constant dense<0.000000e+00> : vector<128xf32>
    %28 = vector.multi_reduction <add>, %27, %cst_8 [1] : vector<128x256xf32> to vector<128xf32>
    %29 = vector.shape_cast %28 : vector<128xf32> to vector<128x1xf32>
    %cst_9 = arith.constant 3.906250e-03 : f32
    %30 = vector.broadcast %cst_9 : f32 to vector<128x1xf32>
    %31 = arith.mulf %29, %30 : vector<128x1xf32>
    %c0_10 = arith.constant 0 : index
    %c0_11 = arith.constant 0 : index
    %32 = vector.load %arg4[%c0_10, %c0_11] : memref<128x128xf32, #tpu.memory_space<vmem>>, vector<128x128xf32>
    %cst_12 = arith.constant dense<0.000000e+00> : vector<128x1xf32>
    %33 = tpu.matmul %32, %31, %cst_12 {dimension_numbers = #tpu.dot_dimension_numbers<[1], [0], [0], [1], [0, 0, 1, 1], [], []>} : vector<128x128xf32>, vector<128x1xf32>, vector<128x1xf32> -> vector<128x1xf32>
    %c0_13 = arith.constant 0 : index
    %c0_14 = arith.constant 0 : index
    %34 = vector.load %arg5[%c0_13, %c0_14] : memref<128x1xf32, #tpu.memory_space<vmem>>, vector<128x1xf32>
    %35 = arith.addf %33, %34 : vector<128x1xf32>
    %36 = arith.negf %35 : vector<128x1xf32>
    %37 = math.exp %36 : vector<128x1xf32>
    %cst_15 = arith.constant 1.000000e+00 : f32
    %38 = vector.broadcast %cst_15 : f32 to vector<128x1xf32>
    %39 = arith.addf %38, %37 : vector<128x1xf32>
    %40 = arith.divf %38, %39 : vector<128x1xf32>
    %41 = vector.broadcast %40 : vector<128x1xf32> to vector<128x256xf32>
    %42 = arith.mulf %27, %41 : vector<128x256xf32>
    %c0_16 = arith.constant 0 : index
    %c0_17 = arith.constant 0 : index
    %c0_18 = arith.constant 0 : index
    %43 = vector.load %arg6[%c0_16, %c0_17, %c0_18] : memref<1x128x256xf32, #tpu.memory_space<vmem>>, vector<1x128x256xf32>
    %44 = vector.shape_cast %43 : vector<1x128x256xf32> to vector<128x256xf32>
    %45 = vector.shape_cast %42 : vector<128x256xf32> to vector<1x128x256xf32>
    tpu.vector_store %arg6[%c0_16, %c0_17, %c0_18], %45 {strides = array<i32>} : memref<1x128x256xf32, #tpu.memory_space<vmem>>, vector<1x128x256xf32>,
    return
  }
  func.func @transform_0(%arg0: i32) -> (i32, i32, i32, i32) {
    %c0_i32 = arith.constant 0 : i32
    %c0_i32_0 = arith.constant 0 : i32
    %c0_i32_1 = arith.constant 0 : i32
    %c0_i32_2 = arith.constant 0 : i32
    return %arg0, %c0_i32, %c0_i32_0, %c0_i32_1 : i32, i32, i32, i32
  }
  func.func @transform_1(%arg0: i32) -> (i32, i32) {
    %c0_i32 = arith.constant 0 : i32
    %c0_i32_0 = arith.constant 0 : i32
    %c0_i32_1 = arith.constant 0 : i32
    return %c0_i32, %c0_i32_0 : i32, i32
  }
  func.func @transform_2(%arg0: i32) -> (i32, i32) {
    %c0_i32 = arith.constant 0 : i32
    %c0_i32_0 = arith.constant 0 : i32
    %c0_i32_1 = arith.constant 0 : i32
    return %c0_i32, %c0_i32_0 : i32, i32
  }
  func.func @transform_3(%arg0: i32) -> (i32, i32) {
    %c0_i32 = arith.constant 0 : i32
    %c0_i32_0 = arith.constant 0 : i32
    %c0_i32_1 = arith.constant 0 : i32
    return %c0_i32, %c0_i32_0 : i32, i32
  }
  func.func @transform_4(%arg0: i32) -> (i32, i32) {
    %c0_i32 = arith.constant 0 : i32
    %c0_i32_0 = arith.constant 0 : i32
    %c0_i32_1 = arith.constant 0 : i32
    return %c0_i32, %c0_i32_0 : i32, i32
  }
  func.func @transform_5(%arg0: i32) -> (i32, i32, i32) {
    %c0_i32 = arith.constant 0 : i32
    %c0_i32_0 = arith.constant 0 : i32
    %c0_i32_1 = arith.constant 0 : i32
    return %arg0, %c0_i32, %c0_i32_0 : i32, i32, i32
  }
}

</mosaic_0001>

<bundles_post_ra>
// kernel: attention_refinement_forward.1
= control target key start
LH: loop header
LB: loop body
LE: loop exit
PB: predicated region body
PF: predicated region fallthrough
CT: control target
= control target key end

     0   :  { %s3264_s18 = smov 0   ;;  %s4698_s0 = inlined_call_operand.vmem [shape: bf16[2,18,18,64], index: 0, kind: input, shape index: {}]   ;;  %s4699_s1 = inlined_call_operand.vmem [shape: bf16[128,576], index: 1, kind: input, shape index: {}]   ;;  %s4700_s2 = inlined_call_operand.vmem [shape: f32[128,1], index: 2, kind: input, shape index: {}]   ;;  %s4701_s3 = inlined_call_operand.vmem [shape: f32[128,128], index: 3, kind: input, shape index: {}]   ;;  %s4702_s4 = inlined_call_operand.vmem [shape: f32[128,1], index: 4, kind: input, shape index: {}]   ;;  %s4703_s5 = inlined_call_operand.vmem [shape: f32[2,128,256], index: 5, kind: output, shape index: {}]  }
   0x1 LB: > { %s2670_s19 = sadd.s32 4294967295, %s3230_s18   ;;  %p2674_p0 = scmp.ge.s32.totalorder %s3230_s18, 1  ;;  %s3230_s18 = sphi %s3264_s18, %s15_s18  }
   0x2   : > { %p187_p1 = scmp.lt.s32.totalorder %s3230_s18, 3 }
   0x4   : > { %p188_p2 = pnand %p2674_p0, %p187_p1 }
   0x6   : > { %191 = sbr.rel (%p188_p2) target bundleno = 1171 (0x493), region = 40 }
   0xd   : > { %p215_p3 = scmp.lt.s32.totalorder %s2670_s19, 1  ;;  %vm280_vm0 = vsmask.f32 3328  ;;  %vm281_vm1 = vsmask.f32 7440  ;;  %vm715_vm2 = vcmask 1042432  }
   0xe   : > { %vm716_vm3 = vcmask 1046532   ;;  %vm3319_vm5 = vmor %vm280_vm0, %vm281_vm1  ;;  %s3232_s24 = smov 64   ;;  %vm1160_vm6 = vcmask 523264   ;;  %v3124_v28 = vld [vmem:[%s4699_s1 + $0x28] ss:$20 sps:$4 sm:$0xff]  }
   0xf   : > { %s4820_s19 = smov (!%p215_p3, %s2670_s19), 1  ;;  %vm3313_vm4 = vmor %vm715_vm2, %vm716_vm3 }
  0x10   : > { %s3073_s20 = smul.u32 216, %s4820_s19  ;;  %s2816_s15 = sshll.u32 %s4820_s19, 8 }
  0x12   : > { %s3278_s23 = scalar_lea.vmem %s4698_s0, %s3073_s20  ;;  %s4597_s20 = scalar_lea.vmem %s4703_s5, %s2816_s15 }
  0x13   : > { %v232_v0 = vld [vmem:[%s3278_s23 + $0x18] sm:$0xf]  ;;  %v233_v1 = vld [vmem:[%s3278_s23 + $0x1c] sm:$0xf]  ;;  %v3283_v2 = vld [vmem:[%s3278_s23 + $0x20] sm:$0x1] }
  0x14   : > { %v332_v3 = vshrl.u32 %v232_v0, 16  ;;  %v335_v4 = vshll.u32 %v232_v0, 16  ;;  %v341_v5 = vshll.u32 %v233_v1, 16  ;;  %v345_v6 = vshrl.u32 %v233_v1, 16  ;;  %v3286_v7 = vld [vmem:[%s3278_s23 + $0x24] sm:$0xf] }
  0x15   : > { %v351_v8 = vshll.u32 %v3283_v2, 16  ;;  %v3290_v9 = vld [vmem:[%s3278_s23 + $0x28] sm:$0xf]  ;;  %v3293_v10 = vld [vmem:[%s3278_s23 + $0x2c] sm:$0x1]  ;;  %v356_v11 = vshrl.u32 %v3286_v7, 16  ;;  %v3296_v12 = vcombine.low %v232_v0, %v233_v1 }
  0x16   : > { %v334_v13 = vrot.slane %v332_v3, 4  ;;  %v337_v14 = vrot.slane %v335_v4, 5  ;;  %v343_v15 = vrot.slane %v341_v5, 5  ;;  %v347_v16 = vrot.slane %v345_v6, 4  ;;  %v3299_v17 = vld [vmem:[%s3278_s23 + $0xc] sm:$0xf] }
  0x17   : > { %v353_v18 = vrot.slane %v351_v8, 5  ;;  %v358_v19 = vrot.slane %v356_v11, 4  ;;  %v359_v20 = vshll.u32 %v3286_v7, 16  ;;  %v365_v21 = vshll.u32 %v3290_v9, 16  ;;  %v3304_v22 = vld [vmem:[%s3278_s23 + $0x10] sm:$0xf] }
  0x18   : > { %v338_v23 = vor.u32 %v337_v14, %v334_v13  ;;  %v348_v24 = vor.u32 %v347_v16, %v343_v15  ;;  %v369_v25 = vshrl.u32 %v3290_v9, 16  ;;  %v375_v26 = vshll.u32 %v3293_v10, 16  ;;  %v3309_v27 = vld [vmem:[%s3278_s23 + $0x14] sm:$0x1]  ;;  %v3329_v42 = vld [vmem:[%s3278_s23 + $0x30] sm:$0xf] }
  0x19   : > { %v361_v30 = vrot.slane %v359_v20, 5  ;;  %v367_v31 = vrot.slane %v365_v21, 5  ;;  %v2679_v32 = vrot.slane %v3299_v17, 9  ;;  %v727_v33 = vrot.slane %v3304_v22, 5  ;;  %v3340_v51 = vld [vmem:[%s3278_s23 + $0x34] sm:$0xf] }
  0x1a   : > { %v339_v34 = vrot.slane %v338_v23, 4  ;;  %v349_v35 = vrot.slane %v348_v24, 4  ;;  %v371_v36 = vrot.slane %v369_v25, 4  ;;  %v377_v37 = vrot.slane %v375_v26, 5  ;;  %v3346_v55 = vld [vmem:[%s3278_s23 + $0x38] sm:$0x1] }
  0x1b   : > { %v362_v38 = vor.u32 %v361_v30, %v358_v19  ;;  %v728_v39 = vsel %vm3313_vm4, %v2679_v32, %v727_v33  ;;  %v729_v40 = vrot.slane %v727_v33, 4  ;;  %v730_v41 = vrot.slane %v3309_v27, 5  ;;  %v3366_v5 = vld [vmem:[%s3278_s23 + $0x3c] sm:$0xf]  ;;  %v3369_v6 = vld [vmem:[%s3278_s23 + $0x40] sm:$0xf] }
  0x1c   : > { %v344_v43 = vsel %vm3319_vm5, %v339_v34, %v343_v15  ;;  %v354_v44 = vsel %vm3319_vm5, %v349_v35, %v353_v18  ;;  %v372_v45 = vor.u32 %v371_v36, %v367_v31  ;;  %v2680_v46 = vrot.slane %v232_v0, 9  ;;  %v3381_v21 = vld [vmem:[%s3278_s23 + $0x44] sm:$0x1] }
  0x1d   : > { %v3335_v47 = vcombine.low %v344_v43, %v354_v44  ;;  %v363_v48 = vrot.slane %v362_v38, 4  ;;  %v731_v49 = vsel %vm3313_vm4, %v729_v40, %v730_v41  ;;  %v734_v50 = vrot.slane %v233_v1, 5  ;;  %v3397_v40 = vld [vmem:[%s3278_s23 + $0x48] sm:$0xf] }
  0x1e   : > { %v373_v52 = vrot.slane %v372_v45, 4  ;;  %v3342_v53 = vcombine.low %v728_v39, %v731_v49  ;;  %v737_v54 = vrot.slane %v3283_v2, 5  ;;  %v380_v56 = vshrl.u32 %v3329_v42, 16 }
  0x1f   : > { %998 = vrot.lane.b32.xlu0 %v3335_v47, %s3232_s24  ;;  %v368_v57 = vsel %vm3319_vm5, %v363_v48, %v367_v31  ;;  %v735_v58 = vsel %vm3313_vm4, %v2680_v46, %v734_v50  ;;  %v736_v59 = vrot.slane %v734_v50, 4  ;;  %v383_v60 = vshll.u32 %v3329_v42, 16  ;;  %v3405_v46 = vld [vmem:[%s3278_s23 + $0x4c] sm:$0xf] }
  0x20   : > { %v378_v61 = vsel %vm3319_vm5, %v373_v52, %v377_v37  ;;  %v382_v62 = vrot.slane %v380_v56, 4  ;;  %v389_v63 = vshll.u32 %v3340_v51, 16  ;;  %v393_v0 = vshrl.u32 %v3340_v51, 16 }
  0x21   : > { %v3360_v1 = vcombine.low %v368_v57, %v378_v61  ;;  %v738_v2 = vsel %vm3313_vm4, %v736_v59, %v737_v54  ;;  %v385_v3 = vrot.slane %v383_v60, 5  ;;  %v399_v4 = vshll.u32 %v3346_v55, 16  ;;  %v3412_v57 = vld [vmem:[%s3278_s23 + $0x50] sm:$0x1] }
  0x22   : > { %v3371_v8 = vcombine.low %v735_v58, %v738_v2  ;;  %v391_v11 = vrot.slane %v389_v63, 5  ;;  %v395_v13 = vrot.slane %v393_v0, 4  ;;  %v2681_v14 = vrot.slane %v3286_v7, 9 }
  0x23   : > { %1000 = vrot.lane.b32.xlu1 %v3360_v1, %s3232_s24  ;;  %1115 = vrot.lane.b32.xlu0 %v3342_v53, %s3232_s24  ;;  %v386_v15 = vor.u32 %v385_v3, %v382_v62  ;;  %v401_v16 = vrot.slane %v399_v4, 5  ;;  %v741_v18 = vrot.slane %v3290_v9, 5  ;;  %v744_v19 = vrot.slane %v3293_v10, 5 }
  0x24   : > { %v396_v20 = vor.u32 %v395_v13, %v391_v11  ;;  %v404_v23 = vshrl.u32 %v3366_v5, 16  ;;  %v407_v24 = vshll.u32 %v3366_v5, 16  ;;  %v413_v25 = vshll.u32 %v3369_v6, 16 }
  0x25   : > { %v387_v26 = vrot.slane %v386_v15, 4  ;;  %v742_v30 = vsel %vm3313_vm4, %v2681_v14, %v741_v18  ;;  %v743_v31 = vrot.slane %v741_v18, 4  ;;  %v417_v32 = vshrl.u32 %v3369_v6, 16  ;;  %v3432_v15 = vld [vmem:[%s3278_s23 + $0x54] sm:$0xf] }
  0x26   : > { %v397_v33 = vrot.slane %v396_v20, 4  ;;  %v406_v10 = vrot.slane %v404_v23, 4  ;;  %v409_v34 = vrot.slane %v407_v24, 5  ;;  %v415_v35 = vrot.slane %v413_v25, 5  ;;  %v3439_v23 = vld [vmem:[%s3278_s23 + $0x58] sm:$0xf] }
  0x27   : > { %1117 = vrot.lane.b32.xlu1 %v3371_v8, %s3232_s24  ;;  %v392_v36 = vsel %vm3319_vm5, %v387_v26, %v391_v11  ;;  %v745_v37 = vsel %vm3313_vm4, %v743_v31, %v744_v19  ;;  %v419_v38 = vrot.slane %v417_v32, 4  ;;  %v423_v39 = vshll.u32 %v3381_v21, 16 }
  0x28   : > { %v402_v41 = vsel %vm3319_vm5, %v397_v33, %v401_v16  ;;  %v3401_v43 = vcombine.low %v742_v30, %v745_v37  ;;  %v410_v44 = vor.u32 %v409_v34, %v406_v10  ;;  %v2682_v45 = vrot.slane %v3329_v42, 9  ;;  %v3449_v33 = vld [vmem:[%s3278_s23 + $0x5c] sm:$0x1] }
  0x29   : > { %v3407_v48 = vcombine.low %v392_v36, %v402_v41  ;;  %v420_v49 = vor.u32 %v419_v38, %v415_v35  ;;  %v425_v50 = vrot.slane %v423_v39, 5  ;;  %v748_v52 = vrot.slane %v3340_v51, 5 }
  0x2a   : > { %4760 = vst [vmem:[#allocation2_spill] sm:$0xff] %v3401_v43  ;;  %v411_v54 = vrot.slane %v410_v44, 4  ;;  %v751_v56 = vrot.slane %v3346_v55, 5  ;;  %v428_v58 = vshrl.u32 %v3397_v40, 16  ;;  %v431_v59 = vshll.u32 %v3397_v40, 16 }
  0x2b   : > { %1002 = vrot.lane.b32.xlu0 %v3407_v48, %s3232_s24  ;;  %1119 = vrot.lane.b32.xlu1 %v3401_v43, %s3232_s24  ;;  %v421_v60 = vrot.slane %v420_v49, 4  ;;  %v749_v61 = vsel %vm3313_vm4, %v2682_v45, %v748_v52  ;;  %v750_v62 = vrot.slane %v748_v52, 4  ;;  %v437_v55 = vshll.u32 %v3405_v46, 16 }
  0x2c   : > { %v416_v63 = vsel %vm3319_vm5, %v411_v54, %v415_v35  ;;  %v430_v0 = vrot.slane %v428_v58, 4  ;;  %v433_v2 = vrot.slane %v431_v59, 5  ;;  %v441_v3 = vshrl.u32 %v3405_v46, 16  ;;  %v3463_v54 = vld [vmem:[%s3278_s23 + $0x60] sm:$0xf] }
  0x2d   : > { %v426_v4 = vsel %vm3319_vm5, %v421_v60, %v425_v50  ;;  %v752_v11 = vsel %vm3313_vm4, %v750_v62, %v751_v56  ;;  %v439_v13 = vrot.slane %v437_v55, 5  ;;  %v447_v14 = vshll.u32 %v3412_v57, 16 }
  0x2e   : > { %v3434_v16 = vcombine.low %v416_v63, %v426_v4  ;;  %v3436_v18 = vcombine.low %v749_v61, %v752_v11  ;;  %v434_v19 = vor.u32 %v433_v2, %v430_v0  ;;  %v443_v20 = vrot.slane %v441_v3, 4  ;;  %v3471_v61 = vld [vmem:[%s3278_s23 + $0x64] sm:$0xf]  ;;  %v3480_v4 = vld [vmem:[%s3278_s23 + $0x68] sm:$0x1] }
  0x2f   : > { %v449_v24 = vrot.slane %v447_v14, 5  ;;  %v2683_v25 = vrot.slane %v3366_v5, 9  ;;  %v755_v26 = vrot.slane %v3369_v6, 5  ;;  %v758_v30 = vrot.slane %v3381_v21, 5 }
  0x30   : > { %4761 = vst [vmem:[#allocation3_spill] sm:$0xff] %v3436_v18  ;;  %1004 = vrot.lane.b32.xlu0 %v3434_v16, %s3232_s24  ;;  %1121 = vrot.lane.b32.xlu1 %v3436_v18, %s3232_s24  ;;  %v435_v31 = vrot.slane %v434_v19, 4  ;;  %v444_v32 = vor.u32 %v443_v20, %v439_v13  ;;  %v452_v10 = vshrl.u32 %v3432_v15, 16  ;;  %v455_v34 = vshll.u32 %v3432_v15, 16 }
  0x31   : > { %v756_v35 = vsel %vm3313_vm4, %v2683_v25, %v755_v26  ;;  %v757_v36 = vrot.slane %v755_v26, 4  ;;  %v461_v21 = vshll.u32 %v3439_v23, 16  ;;  %v465_v37 = vshrl.u32 %v3439_v23, 16  ;;  %v3490_v25 = vld [vmem:[%s3278_s23 + $0x6c] sm:$0xf] }
  0x32   : > { %v440_v38 = vsel %vm3319_vm5, %v435_v31, %v439_v13  ;;  %v445_v39 = vrot.slane %v444_v32, 4  ;;  %v454_v41 = vrot.slane %v452_v10, 4  ;;  %v457_v44 = vrot.slane %v455_v34, 5  ;;  %v3496_v32 = vld [vmem:[%s3278_s23 + $0x70] sm:$0xf] }
  0x33   : > { %v759_v45 = vsel %vm3313_vm4, %v757_v36, %v758_v30  ;;  %v463_v49 = vrot.slane %v461_v21, 5  ;;  %v467_v50 = vrot.slane %v465_v37, 4  ;;  %v471_v52 = vshll.u32 %v3449_v33, 16 }
  0x34   : > { %v450_v56 = vsel %vm3319_vm5, %v445_v39, %v449_v24  ;;  %v3467_v58 = vcombine.low %v756_v35, %v759_v45  ;;  %v458_v59 = vor.u32 %v457_v44, %v454_v41  ;;  %v2684_v60 = vrot.slane %v3397_v40, 9  ;;  %v3508_v41 = vld [vmem:[%s3278_s23 + $0x74] sm:$0x1] }
  0x35   : > { %v3473_v62 = vcombine.low %v440_v38, %v450_v56  ;;  %v468_v55 = vor.u32 %v467_v50, %v463_v49  ;;  %v473_v63 = vrot.slane %v471_v52, 5  ;;  %v762_v0 = vrot.slane %v3405_v46, 5 }
  0x36   : > { %4762 = vst [vmem:[#allocation4_spill] sm:$0xff] %v3467_v58  ;;  %1123 = vrot.lane.b32.xlu1 %v3467_v58, %s3232_s24  ;;  %v459_v2 = vrot.slane %v458_v59, 4  ;;  %v765_v3 = vrot.slane %v3412_v57, 5  ;;  %v476_v11 = vshrl.u32 %v3463_v54, 16  ;;  %v479_v13 = vshll.u32 %v3463_v54, 16 }
  0x37   : > { %1006 = vrot.lane.b32.xlu0 %v3473_v62, %s3232_s24  ;;  %v469_v14 = vrot.slane %v468_v55, 4  ;;  %v763_v19 = vsel %vm3313_vm4, %v2684_v60, %v762_v0  ;;  %v764_v20 = vrot.slane %v762_v0, 4  ;;  %v485_v24 = vshll.u32 %v3471_v61, 16 }
  0x38   : > { %v464_v57 = vsel %vm3319_vm5, %v459_v2, %v463_v49  ;;  %v478_v26 = vrot.slane %v476_v11, 4  ;;  %v481_v30 = vrot.slane %v479_v13, 5  ;;  %v489_v31 = vshrl.u32 %v3471_v61, 16  ;;  %v3524_v2 = vld [vmem:[%s3278_s23] sm:$0xf] }
  0x39   : > { %v474_v10 = vsel %vm3319_vm5, %v469_v14, %v473_v63  ;;  %v766_v34 = vsel %vm3313_vm4, %v764_v20, %v765_v3  ;;  %v487_v35 = vrot.slane %v485_v24, 5  ;;  %v495_v36 = vshll.u32 %v3480_v4, 16 }
  0x3a   : > { %v3503_v21 = vcombine.low %v464_v57, %v474_v10  ;;  %v3505_v37 = vcombine.low %v763_v19, %v766_v34  ;;  %v482_v38 = vor.u32 %v481_v30, %v478_v26  ;;  %v491_v39 = vrot.slane %v489_v31, 4  ;;  %v3532_v26 = vld [vmem:[%s3278_s23 + $0x4] sm:$0xf] }
  0x3b   : > { %v497_v44 = vrot.slane %v495_v36, 5  ;;  %v2685_v45 = vrot.slane %v3432_v15, 9  ;;  %v769_v49 = vrot.slane %v3439_v23, 5  ;;  %v772_v50 = vrot.slane %v3449_v33, 5 }
  0x3c   : > { %4763 = vst [vmem:[#allocation5_spill] sm:$0xff] %v3505_v37  ;;  %1008 = vrot.lane.b32.xlu0 %v3503_v21, %s3232_s24  ;;  %1125 = vrot.lane.b32.xlu1 %v3505_v37, %s3232_s24  ;;  %v483_v52 = vrot.slane %v482_v38, 4  ;;  %v492_v56 = vor.u32 %v491_v39, %v487_v35  ;;  %v500_v59 = vshrl.u32 %v3490_v25, 16  ;;  %v503_v60 = vshll.u32 %v3490_v25, 16 }
  0x3d   : > { %v770_v55 = vsel %vm3313_vm4, %v2685_v45, %v769_v49  ;;  %v771_v63 = vrot.slane %v769_v49, 4  ;;  %v509_v0 = vshll.u32 %v3496_v32, 16  ;;  %v513_v33 = vshrl.u32 %v3496_v32, 16 }
  0x3e   : > { %v488_v3 = vsel %vm3319_vm5, %v483_v52, %v487_v35  ;;  %v493_v11 = vrot.slane %v492_v56, 4  ;;  %v502_v13 = vrot.slane %v500_v59, 4  ;;  %v505_v14 = vrot.slane %v503_v60, 5  ;;  %v3540_v35 = vld [vmem:[%s3278_s23 + $0x8] sm:$0x1] }
  0x3f   : > { %v773_v19 = vsel %vm3313_vm4, %v771_v63, %v772_v50  ;;  %v511_v20 = vrot.slane %v509_v0, 5  ;;  %v515_v24 = vrot.slane %v513_v33, 4  ;;  %v519_v57 = vshll.u32 %v3508_v41, 16  ;;  %v3554_v56 = vld [vmem:[%s3278_s23 + $0x78] sm:$0xf] }
  0x40   : > { %v498_v30 = vsel %vm3319_vm5, %v493_v11, %v497_v44  ;;  %v3536_v31 = vcombine.low %v770_v55, %v773_v19  ;;  %v506_v10 = vor.u32 %v505_v14, %v502_v13  ;;  %v2686_v34 = vrot.slane %v3463_v54, 9 }
  0x41   : > { %v3542_v36 = vcombine.low %v488_v3, %v498_v30  ;;  %v516_v38 = vor.u32 %v515_v24, %v511_v20  ;;  %v521_v39 = vrot.slane %v519_v57, 5  ;;  %v776_v45 = vrot.slane %v3471_v61, 5  ;;  %v3571_v24 = vld [vmem:[%s3278_s23 + $0x7c] sm:$0xf]  ;;  %v3574_v57 = vld [vmem:[%s3278_s23 + $0x80] sm:$0x1] }
  0x42   : > { %4764 = vst [vmem:[#allocation6_spill] sm:$0xff] %v3536_v31  ;;  %1127 = vrot.lane.b32.xlu1 %v3536_v31, %s3232_s24  ;;  %v507_v49 = vrot.slane %v506_v10, 4  ;;  %v779_v50 = vrot.slane %v3480_v4, 5  ;;  %v3550_v44 = vcombine.low %v3299_v17, %v3304_v22  ;;  %v284_v52 = vshrl.u32 %v3524_v2, 16  ;;  %v3604_v31 = vld [vmem:[%s3278_s23 + $0x84] sm:$0xf] }
  0x43   : > { %1010 = vrot.lane.b32.xlu0 %v3542_v36, %s3232_s24  ;;  %v517_v59 = vrot.slane %v516_v38, 4  ;;  %v777_v60 = vsel %vm3313_vm4, %v2686_v34, %v776_v45  ;;  %v778_v55 = vrot.slane %v776_v45, 4  ;;  %v287_v4 = vshll.u32 %v3524_v2, 16 }
  0x44   : > { %v512_v63 = vsel %vm3319_vm5, %v507_v49, %v511_v20  ;;  %v286_v0 = vrot.slane %v284_v52, 4  ;;  %v293_v33 = vshll.u32 %v3532_v26, 16  ;;  %v297_v3 = vshrl.u32 %v3532_v26, 16 }
  0x45   : > { %v522_v11 = vsel %vm3319_vm5, %v517_v59, %v521_v39  ;;  %v780_v13 = vsel %vm3313_vm4, %v778_v55, %v779_v50  ;;  %v289_v14 = vrot.slane %v287_v4, 5  ;;  %v303_v19 = vshll.u32 %v3540_v35, 16 }
  0x46   : > { %v3576_v30 = vcombine.low %v512_v63, %v522_v11  ;;  %v3578_v20 = vcombine.low %v777_v60, %v780_v13  ;;  %v295_v10 = vrot.slane %v293_v33, 5  ;;  %v299_v34 = vrot.slane %v297_v3, 4 }
  0x47   : > { %v290_v38 = vor.u32 %v289_v14, %v286_v0  ;;  %v305_v45 = vrot.slane %v303_v19, 5  ;;  %v524_v39 = vshrl.u32 %v3554_v56, 16  ;;  %v527_v49 = vshll.u32 %v3554_v56, 16 }
  0x48   : > { %4765 = vst [vmem:[#allocation7_spill] sm:$0xff] %v3578_v20  ;;  %1012 = vrot.lane.b32.xlu0 %v3576_v30, %s3232_s24  ;;  %1129 = vrot.lane.b32.xlu1 %v3578_v20, %s3232_s24  ;;  %v300_v50 = vor.u32 %v299_v34, %v295_v10  ;;  %v533_v52 = vshll.u32 %v3571_v24, 16  ;;  %v537_v59 = vshrl.u32 %v3571_v24, 16  ;;  %v543_v60 = vshll.u32 %v3574_v57, 16 }
  0x49   : > { %v291_v55 = vrot.slane %v290_v38, 4  ;;  %v526_v4 = vrot.slane %v524_v39, 4  ;;  %v529_v63 = vrot.slane %v527_v49, 5  ;;  %v2687_v0 = vrot.slane %v3490_v25, 9 }
  0x4a   : > { %v301_v33 = vrot.slane %v300_v50, 4  ;;  %v535_v3 = vrot.slane %v533_v52, 5  ;;  %v539_v11 = vrot.slane %v537_v59, 4  ;;  %v545_v13 = vrot.slane %v543_v60, 5 }
  0x4b   : > { %v296_v14 = vsel %vm3319_vm5, %v291_v55, %v295_v10  ;;  %v530_v19 = vor.u32 %v529_v63, %v526_v4  ;;  %v783_v34 = vrot.slane %v3496_v32, 5  ;;  %v786_v20 = vrot.slane %v3508_v41, 5 }
  0x4c   : > { %1077 = vrot.lane.b32.xlu0 %v3550_v44, %s3232_s24  ;;  %v306_v38 = vsel %vm3319_vm5, %v301_v33, %v305_v45  ;;  %v540_v39 = vor.u32 %v539_v11, %v535_v3  ;;  %v308_v49 = vshrl.u32 %v3299_v17, 16  ;;  %v311_v50 = vshll.u32 %v3299_v17, 16  ;;  %v3614_v11 = vld [vmem:[%s3278_s23 + $0x88] sm:$0xf] }
  0x4d   : > { %v2712_v52 = vcombine.low %v296_v14, %v306_v38  ;;  %v531_v10 = vrot.slane %v530_v19, 4  ;;  %v784_v59 = vsel %vm3313_vm4, %v2687_v0, %v783_v34  ;;  %v785_v60 = vrot.slane %v783_v34, 4 }
  0x4e   : > { %v541_v41 = vrot.slane %v540_v39, 4  ;;  %v310_v55 = vrot.slane %v308_v49, 4  ;;  %v313_v4 = vrot.slane %v311_v50, 5  ;;  %v317_v63 = vshll.u32 %v3304_v22, 16  ;;  %v3621_v39 = vld [vmem:[%s3278_s23 + $0x8c] sm:$0x1] }
  0x4f   : > { %994 = vrot.lane.b32.xlu1 %v2712_v52, %s3232_s24  ;;  %v536_v45 = vsel %vm3319_vm5, %v531_v10, %v535_v3  ;;  %v787_v17 = vsel %vm3313_vm4, %v785_v60, %v786_v20  ;;  %v321_v33 = vshrl.u32 %v3304_v22, 16  ;;  %v327_v0 = vshll.u32 %v3309_v27, 16 }
  0x50   : > { %v546_v14 = vsel %vm3319_vm5, %v541_v41, %v545_v13  ;;  %v3618_v19 = vcombine.low %v784_v59, %v787_v17  ;;  %v314_v34 = vor.u32 %v313_v4, %v310_v55  ;;  %v319_v38 = vrot.slane %v317_v63, 5  ;;  %v3639_v55 = vld [vmem:[%s3278_s23 + $0x90] sm:$0xf] }
  0x51   : > { %v3623_v3 = vcombine.low %v536_v45, %v546_v14  ;;  %v323_v49 = vrot.slane %v321_v33, 4  ;;  %v329_v20 = vrot.slane %v327_v0, 5  ;;  %v548_v22 = vshrl.u32 %v3604_v31, 16 }
  0x52   : > { %4766 = vst [vmem:[#allocation8_spill] sm:$0xff] %v3618_v19  ;;  %v315_v50 = vrot.slane %v314_v34, 4  ;;  %v551_v27 = vshll.u32 %v3604_v31, 16  ;;  %v557_v52 = vshll.u32 %v3614_v11, 16  ;;  %v561_v13 = vshrl.u32 %v3614_v11, 16 }
  0x53   : > { %4767 = vst [vmem:[#allocation9_spill] sm:$0xff] %v3623_v3  ;;  %1014 = vrot.lane.b32.xlu0 %v3623_v3, %s3232_s24  ;;  %1131 = vrot.lane.b32.xlu1 %v3618_v19, %s3232_s24  ;;  %v324_v10 = vor.u32 %v323_v49, %v319_v38  ;;  %v550_v59 = vrot.slane %v548_v22, 4  ;;  %v567_v60 = vshll.u32 %v3621_v39, 16  ;;  %v3636_v41 = vcombine.low %v3286_v7, %v3290_v9  ;;  %v3647_v9 = vld [vmem:[%s3278_s23 + $0x94] sm:$0xf] }
  0x54   : > { %v320_v4 = vsel %vm3319_vm5, %v315_v50, %v319_v38  ;;  %v553_v63 = vrot.slane %v551_v27, 5  ;;  %v559_v45 = vrot.slane %v557_v52, 5  ;;  %v563_v17 = vrot.slane %v561_v13, 4  ;;  %v3657_v52 = vld [vmem:[%s3278_s23 + $0x98] sm:$0x1] }
  0x55   : > { %v325_v33 = vrot.slane %v324_v10, 4  ;;  %v569_v0 = vrot.slane %v567_v60, 5  ;;  %v2688_v14 = vrot.slane %v3554_v56, 9  ;;  %v790_v34 = vrot.slane %v3571_v24, 5 }
  0x56   : > { %v554_v49 = vor.u32 %v553_v63, %v550_v59  ;;  %v564_v22 = vor.u32 %v563_v17, %v559_v45  ;;  %v793_v7 = vrot.slane %v3574_v57, 5  ;;  %v572_v19 = vshrl.u32 %v3639_v55, 16 }
  0x57   : > { %1079 = vrot.lane.b32.xlu0 %v3296_v12, %s3232_s24  ;;  %v330_v38 = vsel %vm3319_vm5, %v325_v33, %v329_v20  ;;  %v791_v50 = vsel %vm3313_vm4, %v2688_v14, %v790_v34  ;;  %v792_v27 = vrot.slane %v790_v34, 4  ;;  %v575_v13 = vshll.u32 %v3639_v55, 16 }
  0x58   : > { %v3660_v57 = vcombine.low %v320_v4, %v330_v38  ;;  %v555_v10 = vrot.slane %v554_v49, 4  ;;  %v565_v59 = vrot.slane %v564_v22, 4  ;;  %v574_v60 = vrot.slane %v572_v19, 4  ;;  %v3676_v49 = vld [vmem:[%s3278_s23 + $0x9c] sm:$0xf] }
  0x59   : > { %v794_v63 = vsel %vm3313_vm4, %v792_v27, %v793_v7  ;;  %v577_v17 = vrot.slane %v575_v13, 5  ;;  %v581_v20 = vshll.u32 %v3647_v9, 16  ;;  %v585_v33 = vshrl.u32 %v3647_v9, 16  ;;  %v3681_v13 = vld [vmem:[%s3278_s23 + $0xa0] sm:$0xf] }
  0x5a   : > { %996 = vrot.lane.b32.xlu1 %v3660_v57, %s3232_s24  ;;  %v560_v14 = vsel %vm3319_vm5, %v555_v10, %v559_v45  ;;  %v570_v4 = vsel %vm3319_vm5, %v565_v59, %v569_v0  ;;  %v3672_v34 = vcombine.low %v791_v50, %v794_v63  ;;  %v591_v19 = vshll.u32 %v3657_v52, 16 }
  0x5b   : > { %v3678_v22 = vcombine.low %v560_v14, %v570_v4  ;;  %v578_v7 = vor.u32 %v577_v17, %v574_v60  ;;  %v583_v38 = vrot.slane %v581_v20, 5  ;;  %v587_v27 = vrot.slane %v585_v33, 4  ;;  %v3693_v60 = vld [vmem:[%s3278_s23 + $0xa4] sm:$0x1] }
  0x5c   : > { %4768 = vst [vmem:[#allocation10_spill] sm:$0xff] %v3672_v34  ;;  %v593_v37 = vrot.slane %v591_v19, 5  ;;  %v2689_v45 = vrot.slane %v3604_v31, 9  ;;  %v797_v10 = vrot.slane %v3614_v11, 5  ;;  %v800_v0 = vrot.slane %v3621_v39, 5 }
  0x5d   : > { %4769 = vst [vmem:[#allocation11_spill] sm:$0xff] %v3678_v22  ;;  %1016 = vrot.lane.b32.xlu0 %v3678_v22, %s3232_s24  ;;  %v579_v50 = vrot.slane %v578_v7, 4  ;;  %v588_v59 = vor.u32 %v587_v27, %v583_v38  ;;  %v3690_v63 = vcombine.low %v3329_v42, %v3340_v51  ;;  %v596_v17 = vshrl.u32 %v3676_v49, 16 }
  0x5e   : > { %1133 = vrot.lane.b32.xlu1 %v3672_v34, %s3232_s24  ;;  %v798_v39 = vsel %vm3313_vm4, %v2689_v45, %v797_v10  ;;  %v799_v20 = vrot.slane %v797_v10, 4  ;;  %v599_v33 = vshll.u32 %v3676_v49, 16  ;;  %v605_v14 = vshll.u32 %v3681_v13, 16  ;;  %v3709_v10 = vld [vmem:[%s3278_s23 + $0xa8] sm:$0xf] }
  0x5f   : > { %v584_v42 = vsel %vm3319_vm5, %v579_v50, %v583_v38  ;;  %v589_v51 = vrot.slane %v588_v59, 4  ;;  %v598_v4 = vrot.slane %v596_v17, 4  ;;  %v609_v19 = vshrl.u32 %v3681_v13, 16 }
  0x60   : > { %v801_v7 = vsel %vm3313_vm4, %v799_v20, %v800_v0  ;;  %v601_v27 = vrot.slane %v599_v33, 5  ;;  %v607_v34 = vrot.slane %v605_v14, 5  ;;  %v615_v45 = vshll.u32 %v3693_v60, 16  ;;  %v3722_v0 = vld [vmem:[%s3278_s23 + $0xac] sm:$0xf] }
  0x61   : > { %1081 = vrot.lane.b32.xlu0 %v3636_v41, %s3232_s24  ;;  %v594_v38 = vsel %vm3319_vm5, %v589_v51, %v593_v37  ;;  %v3715_v50 = vcombine.low %v798_v39, %v801_v7  ;;  %v611_v59 = vrot.slane %v609_v19, 4  ;;  %v3719_v17 = vcombine.low %v3366_v5, %v3369_v6  ;;  %v3733_v6 = vld [vmem:[%s3278_s23 + $0xb0] sm:$0x1] }
  0x62   : > { %v3724_v20 = vcombine.low %v584_v42, %v594_v38  ;;  %v602_v33 = vor.u32 %v601_v27, %v598_v4  ;;  %v617_v14 = vrot.slane %v615_v45, 5  ;;  %v2690_v58 = vrot.slane %v3639_v55, 9 }
  0x63   : > { %4770 = vst [vmem:[#allocation12_spill] sm:$0xff] %v3715_v50  ;;  %v612_v22 = vor.u32 %v611_v59, %v607_v34  ;;  %v804_v18 = vrot.slane %v3647_v9, 5  ;;  %v807_v37 = vrot.slane %v3657_v52, 5  ;;  %v620_v39 = vshrl.u32 %v3709_v10, 16 }
  0x64   : > { %4771 = vst [vmem:[#allocation13_spill] sm:$0xff] %v3724_v20  ;;  %1018 = vrot.lane.b32.xlu1 %v3724_v20, %s3232_s24  ;;  %v603_v5 = vrot.slane %v602_v33, 4  ;;  %v623_v42 = vshll.u32 %v3709_v10, 16  ;;  %v629_v51 = vshll.u32 %v3722_v0, 16  ;;  %v633_v4 = vshrl.u32 %v3722_v0, 16 }
  0x65   : > { %1135 = vrot.lane.b32.xlu0 %v3715_v50, %s3232_s24  ;;  %v613_v19 = vrot.slane %v612_v22, 4  ;;  %v805_v52 = vsel %vm3313_vm4, %v2690_v58, %v804_v18  ;;  %v806_v7 = vrot.slane %v804_v18, 4  ;;  %v622_v27 = vrot.slane %v620_v39, 4  ;;  %v3751_v58 = vld [vmem:[%s3278_s23 + $0xb4] sm:$0xf] }
  0x66   : > { %v608_v45 = vsel %vm3319_vm5, %v603_v5, %v607_v34  ;;  %v625_v38 = vrot.slane %v623_v42, 5  ;;  %v631_v59 = vrot.slane %v629_v51, 5  ;;  %v635_v33 = vrot.slane %v633_v4, 4 }
  0x67   : > { %v618_v20 = vsel %vm3319_vm5, %v613_v19, %v617_v14  ;;  %v808_v3 = vsel %vm3313_vm4, %v806_v7, %v807_v37  ;;  %v639_v22 = vshll.u32 %v3733_v6, 16  ;;  %v2691_v50 = vrot.slane %v3676_v49, 9  ;;  %v3760_v14 = vld [vmem:[%s3278_s23 + $0xb8] sm:$0xf] }
  0x68   : > { %1083 = vrot.lane.b32.xlu1 %v3690_v63, %s3232_s24  ;;  %v3755_v18 = vcombine.low %v608_v45, %v618_v20  ;;  %v3757_v34 = vcombine.low %v805_v52, %v808_v3  ;;  %v626_v39 = vor.u32 %v625_v38, %v622_v27  ;;  %v636_v5 = vor.u32 %v635_v33, %v631_v59  ;;  %v3775_v45 = vld [vmem:[%s3278_s23 + $0xbc] sm:$0x1] }
  0x69   : > { %v641_v42 = vrot.slane %v639_v22, 5  ;;  %v811_v37 = vrot.slane %v3681_v13, 5  ;;  %v814_v51 = vrot.slane %v3693_v60, 5  ;;  %v3766_v4 = vcombine.low %v3397_v40, %v3405_v46 }
  0x6a   : > { %4772 = vst [vmem:[#allocation14_spill] sm:$0xff] %v3755_v18  ;;  %4773 = vst [vmem:[#allocation15_spill] sm:$0xff] %v3757_v34  ;;  %1020 = vrot.lane.b32.xlu0 %v3755_v18, %s3232_s24  ;;  %v627_v20 = vrot.slane %v626_v39, 4  ;;  %v637_v19 = vrot.slane %v636_v5, 4  ;;  %v644_v3 = vshrl.u32 %v3751_v58, 16  ;;  %v647_v52 = vshll.u32 %v3751_v58, 16 }
  0x6b   : > { %v812_v7 = vsel %vm3313_vm4, %v2691_v50, %v811_v37  ;;  %v813_v27 = vrot.slane %v811_v37, 4  ;;  %v653_v60 = vshll.u32 %v3760_v14, 16  ;;  %v657_v40 = vshrl.u32 %v3760_v14, 16  ;;  %v3790_v18 = vld [vmem:[%s3278_s23 + $0xc0] sm:$0xf] }
  0x6c   : > { %1137 = vrot.lane.b32.xlu1 %v3757_v34, %s3232_s24  ;;  %v632_v46 = vsel %vm3319_vm5, %v627_v20, %v631_v59  ;;  %v642_v38 = vsel %vm3319_vm5, %v637_v19, %v641_v42  ;;  %v646_v33 = vrot.slane %v644_v3, 4  ;;  %v649_v22 = vrot.slane %v647_v52, 5  ;;  %v3802_v19 = vld [vmem:[%s3278_s23 + $0xc4] sm:$0xf] }
  0x6d   : > { %v3785_v50 = vcombine.low %v632_v46, %v642_v38  ;;  %v815_v39 = vsel %vm3313_vm4, %v813_v27, %v814_v51  ;;  %v655_v5 = vrot.slane %v653_v60, 5  ;;  %v659_v37 = vrot.slane %v657_v40, 4  ;;  %v3810_v40 = vld [vmem:[%s3278_s23 + $0xc8] sm:$0x1] }
  0x6e   : > { %1085 = vrot.lane.b32.xlu0 %v3719_v17, %s3232_s24  ;;  %v3794_v34 = vcombine.low %v812_v7, %v815_v39  ;;  %v650_v59 = vor.u32 %v649_v22, %v646_v33  ;;  %v663_v42 = vshll.u32 %v3775_v45, 16  ;;  %v3799_v20 = vcombine.low %v3432_v15, %v3439_v23 }
  0x6f   : > { %4774 = vst [vmem:[#allocation16_spill] sm:$0xff] %v3785_v50  ;;  %v660_v51 = vor.u32 %v659_v37, %v655_v5  ;;  %v2692_v3 = vrot.slane %v3709_v10, 9  ;;  %v818_v52 = vrot.slane %v3722_v0, 5  ;;  %v821_v27 = vrot.slane %v3733_v6, 5 }
  0x70   : > { %4775 = vst [vmem:[#allocation17_spill] sm:$0xff] %v3794_v34  ;;  %1022 = vrot.lane.b32.xlu1 %v3785_v50, %s3232_s24  ;;  %v651_v7 = vrot.slane %v650_v59, 4  ;;  %v665_v60 = vrot.slane %v663_v42, 5  ;;  %v831_v15 = vshrl.u32 %v3790_v18, 16  ;;  %v834_v23 = vshll.u32 %v3790_v18, 16 }
  0x71   : > { %v661_v46 = vrot.slane %v660_v51, 4  ;;  %v819_v38 = vsel %vm3313_vm4, %v2692_v3, %v818_v52  ;;  %v820_v33 = vrot.slane %v818_v52, 4  ;;  %v840_v22 = vshll.u32 %v3802_v19, 16  ;;  %v3828_v50 = vld [vmem:[%s3278_s23 + $0xcc] sm:$0xf] }
  0x72   : > { %1139 = vrot.lane.b32.xlu0 %v3794_v34, %s3232_s24  ;;  %v656_v6 = vsel %vm3319_vm5, %v651_v7, %v655_v5  ;;  %v833_v39 = vrot.slane %v831_v15, 4  ;;  %v836_v37 = vrot.slane %v834_v23, 5  ;;  %v844_v59 = vshrl.u32 %v3802_v19, 16  ;;  %v3837_v34 = vld [vmem:[%s3278_s23 + $0xd0] sm:$0xf] }
  0x73   : > { %v666_v42 = vsel %vm3319_vm5, %v661_v46, %v665_v60  ;;  %v822_v51 = vsel %vm3313_vm4, %v820_v33, %v821_v27  ;;  %v842_v3 = vrot.slane %v840_v22, 5  ;;  %v850_v52 = vshll.u32 %v3810_v40, 16 }
  0x74   : > { %1087 = vrot.lane.b32.xlu1 %v3766_v4, %s3232_s24  ;;  %v3832_v5 = vcombine.low %v656_v6, %v666_v42  ;;  %v3834_v7 = vcombine.low %v819_v38, %v822_v51  ;;  %v837_v15 = vor.u32 %v836_v37, %v833_v39  ;;  %v846_v23 = vrot.slane %v844_v59, 4  ;;  %v3849_v6 = vld [vmem:[%s3278_s23 + $0xd4] sm:$0x1] }
  0x75   : > { %v852_v60 = vrot.slane %v850_v52, 5  ;;  %v2693_v27 = vrot.slane %v3751_v58, 9  ;;  %v825_v46 = vrot.slane %v3760_v14, 5  ;;  %v828_v33 = vrot.slane %v3775_v45, 5  ;;  %4778 = vst [vmem:[#allocation20_spill] sm:$0xff] %v3849_v6 }
  0x76   : > { %4776 = vst [vmem:[#allocation18_spill] sm:$0xff] %v3832_v5  ;;  %4777 = vst [vmem:[#allocation19_spill] sm:$0xff] %v3834_v7  ;;  %1024 = vrot.lane.b32.xlu0 %v3832_v5, %s3232_s24  ;;  %v838_v22 = vrot.slane %v837_v15, 4  ;;  %v847_v43 = vor.u32 %v846_v23, %v842_v3  ;;  %v3846_v38 = vcombine.low %v3463_v54, %v3471_v61  ;;  %v865_v39 = vshrl.u32 %v3828_v50, 16 }
  0x77   : > { %v826_v37 = vsel %vm3313_vm4, %v2693_v27, %v825_v46  ;;  %v827_v59 = vrot.slane %v825_v46, 4  ;;  %v868_v42 = vshll.u32 %v3828_v50, 16  ;;  %v874_v45 = vshll.u32 %v3837_v34, 16 }
  0x78   : > { %1141 = vrot.lane.b32.xlu1 %v3834_v7, %s3232_s24  ;;  %v843_v51 = vsel %vm3319_vm5, %v838_v22, %v842_v3  ;;  %v848_v54 = vrot.slane %v847_v43, 4  ;;  %v867_v61 = vrot.slane %v865_v39, 4  ;;  %v878_v52 = vshrl.u32 %v3837_v34, 16 }
  0x79   : > { %v829_v15 = vsel %vm3313_vm4, %v827_v59, %v828_v33  ;;  %v870_v23 = vrot.slane %v868_v42, 5  ;;  %v876_v27 = vrot.slane %v874_v45, 5  ;;  %v884_v46 = vshll.u32 %v3849_v6, 16 }
  0x7a   : > { %1089 = vrot.lane.b32.xlu0 %v3799_v20, %s3232_s24  ;;  %v853_v7 = vsel %vm3319_vm5, %v848_v54, %v852_v60  ;;  %v3868_v5 = vcombine.low %v826_v37, %v829_v15  ;;  %v880_v3 = vrot.slane %v878_v52, 4  ;;  %v3874_v33 = vcombine.low %v3490_v25, %v3496_v32 }
  0x7b   : > { %v3870_v43 = vcombine.low %v843_v51, %v853_v7  ;;  %v871_v22 = vor.u32 %v870_v23, %v867_v61  ;;  %v886_v39 = vrot.slane %v884_v46, 5  ;;  %v2694_v42 = vrot.slane %v3790_v18, 9 }
  0x7c   : > { %v881_v59 = vor.u32 %v880_v3, %v876_v27  ;;  %v859_v45 = vrot.slane %v3802_v19, 5  ;;  %v862_v6 = vrot.slane %v3810_v40, 5  ;;  %v2678_v54 = vrot.slane %v3524_v2, 9 }
  0x7d   : > { %1153 = vrot.lane.b32.xlu1 %v3870_v43, %s3232_s24  ;;  %v872_v60 = vrot.slane %v871_v22, 4  ;;  %v720_v61 = vrot.slane %v3532_v26, 5  ;;  %v723_v23 = vrot.slane %v3540_v35, 5  ;;  %v3913_v35 = vcombine.low %v3554_v56, %v3571_v24 }
  0x7e   : > { %1143 = vrot.lane.b32.xlu0 %v3868_v5, %s3232_s24  ;;  %v882_v7 = vrot.slane %v881_v59, 4  ;;  %v860_v37 = vsel %vm3313_vm4, %v2694_v42, %v859_v45  ;;  %v861_v25 = vrot.slane %v859_v45, 4  ;;  %v3921_v22 = vcombine.low %v3604_v31, %v3614_v11 }
  0x7f   : > { %v877_v32 = vsel %vm3319_vm5, %v872_v60, %v876_v27  ;;  %v2696_v27 = vcombine.low %v3524_v2, %v3532_v26  ;;  %v3902_v29 = vsel %vm3313_vm4, %v2678_v54, %v720_v61  ;;  %v3933_v56 = vcombine.low %v3676_v49, %v3681_v13 }
  0x80   : > { %v887_v51 = vsel %vm3319_vm5, %v882_v7, %v886_v39  ;;  %v863_v40 = vsel %vm3313_vm4, %v861_v25, %v862_v6  ;;  %v722_v6 = vrot.slane %v720_v61, 4  ;;  %v3927_v39 = vcombine.low %v3639_v55, %v3647_v9 }
  0x81   : > { %1091 = vrot.lane.b32.xlu1 %v3846_v38, %s3232_s24  ;;  %v2748_v52 = vcombine.low %v877_v32, %v887_v51  ;;  %v3895_v15 = vcombine.low %v860_v37, %v863_v40  ;;  %v3939_v31 = vcombine.low %v3709_v10, %v3722_v0  ;;  %v3945_v24 = vcombine.low %v3751_v58, %v3760_v14 }
  0x82   : > { %v3907_v46 = vsel %vm3313_vm4, %v722_v6, %v723_v23  ;;  %v3951_v55 = vcombine.low %v3790_v18, %v3802_v19 }
  0x83   : > { %1155 = vrot.lane.b32.xlu0 %v2748_v52, %s3232_s24  ;;  %v2728_v3 = vcombine.low %v3902_v29, %v3907_v46 }
  0x85   : > { %1145 = vrot.lane.b32.xlu1 %v3895_v15, %s3232_s24 }
  0x87   : > { %1093 = vrot.lane.b32.xlu0 %v3874_v33, %s3232_s24 }
  0x89   : > { %1095 = vrot.lane.b32.xlu1 %v3913_v35, %s3232_s24 }
  0x8b   : > { %1097 = vrot.lane.b32.xlu0 %v3921_v22, %s3232_s24 }
  0x8d   : > { %1099 = vrot.lane.b32.xlu1 %v3927_v39, %s3232_s24 }
  0x8f   : > { %1101 = vrot.lane.b32.xlu0 %v3933_v56, %s3232_s24 }
  0x91   : > { %v999_v11 = vpop.permute.xlu0 %998  ;;  %1103 = vrot.lane.b32.xlu1 %v3939_v31, %s3232_s24 }
  0x92   : > { %v3955_v9 = vsel %vm1160_vm6, %v3296_v12, %v999_v11 }
  0x93   : > { %1876 = vmatprep.subr.bf16.mxu0 %v3955_v9  ;;  %1105 = vrot.lane.b32.xlu0 %v3945_v24, %s3232_s24 }
  0x95   : > { %v1001_v49 = vpop.permute.xlu1 %1000  ;;  %v1116_v13 = vpop.permute.xlu0 %1115  ;;  %1107 = vrot.lane.b32.xlu1 %v3951_v55, %s3232_s24 }
  0x96   : > { %v1291_v10 = vsel %vm1160_vm6, %v3660_v57, %v1116_v13  ;;  %v3966_v0 = vsel %vm1160_vm6, %v3636_v41, %v1001_v49 }
  0x97   : > { %1877 = vmatpush1.bf16.xpose.msra.mxu0 %v1291_v10 }
  0x98   : > { %1878 = vmatprep.subr.bf16.mxu0 %v3966_v0 }
  0x99   : > { %v1118_v12 = vpop.permute.xlu1 %1117 }
  0x9a   : > { %v1295_v58 = vsel %vm1160_vm6, %v3335_v47, %v1118_v12  ;;  %v3106_v47 = vld [vmem:[%s4699_s1 + $0xc] ss:$20 sps:$4 sm:$0xff]  }
  0x9b   : > { %1908 = vmatprep.mubr.bf16.mxu0 %v3106_v47  ;;  %v4779_v12 = vld [vmem:[#allocation2_spill] sm:$0xff] }
  0x9d   : > { %v1003_v18 = vpop.permute.xlu0 %1002  ;;  %v1120_v14 = vpop.permute.xlu1 %1119 }
  0x9e   : > { %v3973_v19 = vsel %vm1160_vm6, %v3690_v63, %v1003_v18  ;;  %v1299_v41 = vsel %vm1160_vm6, %v3360_v1, %v1120_v14  ;;  %v4780_v14 = vld [vmem:[#allocation9_spill] sm:$0xff] }
  0x9f   : > { %1879 = vmatpush1.bf16.xpose.msra.mxu0 %v1295_v58 }
  0xa0   : > { %1880 = vmatprep.subr.bf16.mxu0 %v3973_v19 }
  0xa2   : > { %v1005_v57 = vpop.permute.xlu0 %1004  ;;  %v1122_v59 = vpop.permute.xlu1 %1121 }
  0xa3   : > { %v3980_v42 = vsel %vm1160_vm6, %v3719_v17, %v1005_v57  ;;  %v1303_v60 = vsel %vm1160_vm6, %v3407_v48, %v1122_v59  ;;  %v4781_v59 = vld [vmem:[#allocation3_spill] sm:$0xff] }
  0xa7   : > { %1881 = vmatpush1.bf16.xpose.msra.mxu0 %v1299_v41 }
  0xa8   : > { %1882 = vmatprep.subr.bf16.mxu0 %v3980_v42  ;;  %v1124_v45 = vpop.permute.xlu1 %1123 }
  0xa9   : > { %v1007_v63 = vpop.permute.xlu0 %1006  ;;  %v1307_v37 = vsel %vm1160_vm6, %v3434_v16, %v1124_v45  ;;  %v4782_v45 = vld [vmem:[#allocation11_spill] sm:$0xff] }
  0xaa   : > { %v3990_v1 = vsel %vm1160_vm6, %v3766_v4, %v1007_v63 }
  0xae   : > { %v1009_v7 = vpop.permute.xlu0 %1008  ;;  %v1126_v17 = vpop.permute.xlu1 %1125 }
  0xaf   : > { %1883 = vmatpush1.bf16.xpose.msra.mxu0 %v1303_v60  ;;  %v3997_v51 = vsel %vm1160_vm6, %v3799_v20, %v1009_v7  ;;  %v1311_v40 = vsel %vm1160_vm6, %v3473_v62, %v1126_v17  ;;  %v3118_v20 = vld [vmem:[%s4699_s1 + $0x4] ss:$20 sps:$4 sm:$0xff]   ;;  %v4783_v7 = vld [vmem:[#allocation4_spill] sm:$0xff] }
  0xb0   : > { %1884 = vmatprep.subr.bf16.mxu0 %v3990_v1  ;;  %1795 = vmatprep.mubr.bf16.mxu1 %v3118_v20 }
  0xb4   : > { %v1128_v32 = vpop.permute.xlu1 %1127 }
  0xb5   : > { %v1011_v25 = vpop.permute.xlu0 %1010 }
  0xb6   : > { %v4004_v54 = vsel %vm1160_vm6, %v3846_v38, %v1011_v25  ;;  %v1315_v38 = vsel %vm1160_vm6, %v3503_v21, %v1128_v32 }
  0xb7   : > { %1885 = vmatpush1.bf16.xpose.msra.mxu0 %v1307_v37 }
  0xb8   : > { %1886 = vmatprep.subr.bf16.mxu0 %v3997_v51 }
  0xba   : > { %v1013_v48 = vpop.permute.xlu0 %1012  ;;  %v1130_v4 = vpop.permute.xlu1 %1129 }
  0xbb   : > { %v4019_v29 = vsel %vm1160_vm6, %v3874_v33, %v1013_v48  ;;  %v1319_v26 = vsel %vm1160_vm6, %v3542_v36, %v1130_v4  ;;  %v4784_v48 = vld [vmem:[#allocation13_spill] sm:$0xff] }
  0xbe   : > { %v1078_v61 = vpop.permute.xlu0 %1077 }
  0xbf   : > { %v1227_v16 = vsel %vm1160_vm6, %v2728_v3, %v1078_v61  ;;  %1887 = vmatpush1.bf16.xpose.msra.mxu0 %v1311_v40  ;;  %v4785_v40 = vld [vmem:[#allocation5_spill] sm:$0xff] }
  0xc0   : > { %1763 = vmatprep.subr.bf16.mxu1 %v1227_v16  ;;  %1888 = vmatprep.subr.bf16.mxu0 %v4004_v54 }
  0xc1   : > { %v995_v52 = vpop.permute.xlu1 %994 }
  0xc2   : > { %v1163_v62 = vsel %vm1160_vm6, %v2696_v27, %v995_v52  ;;  %v4786_v52 = vld [vmem:[#allocation6_spill] sm:$0xff] }
  0xc3   : > { %1764 = vmatpush1.bf16.xpose.msra.mxu1 %v1163_v62 }
  0xc5   : > { %v1015_v23 = vpop.permute.xlu0 %1014  ;;  %v1132_v6 = vpop.permute.xlu1 %1131 }
  0xc6   : > { %v4030_v33 = vsel %vm1160_vm6, %v3913_v35, %v1015_v23  ;;  %v1323_v36 = vsel %vm1160_vm6, %v3576_v30, %v1132_v6 }
  0xc7   : > { %1889 = vmatpush1.bf16.xpose.msra.mxu0 %v1315_v38  ;;  %v4787_v38 = vld [vmem:[#allocation14_spill] sm:$0xff] }
  0xc8   : > { %1890 = vmatprep.subr.bf16.mxu0 %v4019_v29 }
  0xc9   : > { %v1080_v46 = vpop.permute.xlu0 %1079 }
  0xca   : > { %v1231_v3 = vsel %vm1160_vm6, %v3342_v53, %v1080_v46 }
  0xcb   : > { %1765 = vmatprep.subr.bf16.mxu1 %v1231_v3  ;;  %v4788_v3 = vld [vmem:[#allocation7_spill] sm:$0xff] }
  0xcc   : > { %v997_v2 = vpop.permute.xlu1 %996 }
  0xcd   : > { %v1167_v21 = vsel %vm1160_vm6, %v3550_v44, %v997_v2 }
  0xce   : > { %1766 = vmatpush1.bf16.xpose.msra.mxu1 %v1167_v21 }
  0xcf   : > { %v1017_v27 = vpop.permute.xlu0 %1016  ;;  %1891 = vmatpush1.bf16.xpose.msra.mxu0 %v1319_v26  ;;  %v4789_v26 = vld [vmem:[#allocation16_spill] sm:$0xff] }
  0xd0   : > { %v1134_v11 = vpop.permute.xlu1 %1133  ;;  %1892 = vmatprep.subr.bf16.mxu0 %v4030_v33  ;;  %v4039_v44 = vsel %vm1160_vm6, %v3921_v22, %v1017_v27 }
  0xd1   : > { %v1327_v30 = vsel %vm1160_vm6, %v4780_v14, %v1134_v11  ;;  %v4790_v11 = vld [vmem:[#allocation8_spill] sm:$0xff] }
  0xd3   : > { %v1082_v49 = vpop.permute.xlu0 %1081 }
  0xd4   : > { %v1235_v53 = vsel %vm1160_vm6, %v3371_v8, %v1082_v49 }
  0xd5   : > { %1767 = vmatprep.subr.bf16.mxu1 %v1235_v53  ;;  %v4791_v53 = vld [vmem:[#allocation18_spill] sm:$0xff] }
  0xd6   : > { %1768 = vmatpush1.bf16.xpose.msra.mxu1 %v3955_v9  ;;  %v1019_v35 = vpop.permute.xlu1 %1018 }
  0xd7   : > { %v1136_v13 = vpop.permute.xlu0 %1135  ;;  %1893 = vmatpush1.bf16.xpose.msra.mxu0 %v1323_v36  ;;  %v4049_v22 = vsel %vm1160_vm6, %v3927_v39, %v1019_v35 }
  0xd8   : > { %1894 = vmatprep.subr.bf16.mxu0 %v4039_v44  ;;  %v1331_v60 = vsel %vm1160_vm6, %v4782_v45, %v1136_v13  ;;  %v4792_v13 = vld [vmem:[#allocation10_spill] sm:$0xff] }
  0xd9   : > { %v1413_v45 = vld [vmem:[%s4700_s2 + $0x20] sm:$0xff] }
  0xda   : > { %v1084_v10 = vpop.permute.xlu1 %1083 }
  0xdb   : > { %v1239_v58 = vsel %vm1160_vm6, %v4779_v12, %v1084_v10 }
  0xdc   : > { %1769 = vmatprep.subr.bf16.mxu1 %v1239_v58  ;;  %v1021_v18 = vpop.permute.xlu0 %1020 }
  0xdd   : > { %v4059_v39 = vsel %vm1160_vm6, %v3933_v56, %v1021_v18  ;;  %v1409_v18 = vld [vmem:[%s4700_s2] sm:$0xff] }
  0xde   : > { %1770 = vmatpush1.bf16.xpose.msra.mxu1 %v3966_v0  ;;  %v1138_v9 = vpop.permute.xlu1 %1137 }
  0xdf   : > { %1895 = vmatpush1.bf16.xpose.msra.mxu0 %v1327_v30  ;;  %v1335_v4 = vsel %vm1160_vm6, %v4784_v48, %v1138_v9  ;;  %v1411_v30 = vld [vmem:[%s4700_s2 + $0x10] sm:$0xff]  ;;  %v1418_v48 = vld [vmem:[%s4700_s2 + $0x48] sm:$0xff] }
  0xe0   : > { %v1086_v57 = vpop.permute.xlu0 %1085  ;;  %1896 = vmatprep.subr.bf16.mxu0 %v4049_v22  ;;  %v4793_v9 = vld [vmem:[#allocation12_spill] sm:$0xff] }
  0xe1   : > { %v1243_v41 = vsel %vm1160_vm6, %v4781_v59, %v1086_v57 }
  0xe2   : > { %1771 = vmatprep.subr.bf16.mxu1 %v1243_v41  ;;  %v1023_v47 = vpop.permute.xlu1 %1022  ;;  %v1729_v41 = vsel %vm1160_vm6, %v3371_v8, 0 }
  0xe4   : > { %v1140_v63 = vpop.permute.xlu0 %1139 }
  0xe5   : > { %v1339_v23 = vsel %vm1160_vm6, %v4787_v38, %v1140_v63  ;;  %v1414_v63 = vld [vmem:[%s4700_s2 + $0x28] sm:$0xff]  ;;  %v3113_v38 = vld [vmem:[%s4699_s1 + $0x84] ss:$20 sps:$4 sm:$0xff]  }
  0xe6   : > { %1772 = vmatpush1.bf16.xpose.msra.mxu1 %v3973_v19  ;;  %v1088_v0 = vpop.permute.xlu1 %1087  ;;  %v4071_v19 = vsel %vm1160_vm6, %v3939_v31, %v1023_v47  ;;  %v3107_v47 = vld [vmem:[%s4699_s1 + $0x34] ss:$20 sps:$4 sm:$0xff]  }
  0xe7   : > { %v1247_v17 = vsel %vm1160_vm6, %v4783_v7, %v1088_v0  ;;  %1897 = vmatpush1.bf16.xpose.msra.mxu0 %v1331_v60  ;;  %v1416_v60 = vld [vmem:[%s4700_s2 + $0x38] sm:$0xff]  ;;  %v1415_v0 = vld [vmem:[%s4700_s2 + $0x30] sm:$0xff] }
  0xe8   : > { %1773 = vmatprep.subr.bf16.mxu1 %v1247_v17  ;;  %v1025_v37 = vpop.permute.xlu0 %1024  ;;  %1898 = vmatprep.subr.bf16.mxu0 %v4059_v39  ;;  %v4794_v17 = vld [vmem:[#allocation15_spill] sm:$0xff] }
  0xe9   : > { %v4081_v31 = vsel %vm1160_vm6, %v3945_v24, %v1025_v37 }
  0xea   : > { %v1142_v25 = vpop.permute.xlu1 %1141 }
  0xeb   : > { %v1343_v21 = vsel %vm1160_vm6, %v4789_v26, %v1142_v25  ;;  %v1731_v25 = vsel %vm1160_vm6, %v4779_v12, 0 }
  0xec   : > { %v1090_v32 = vpop.permute.xlu0 %1089 }
  0xed   : > { %v1251_v56 = vsel %vm1160_vm6, %v4785_v40, %v1090_v32  ;;  %v3110_v32 = vld [vmem:[%s4699_s1 + $0x5c] ss:$20 sps:$4 sm:$0xff]  }
  0xee   : > { %1774 = vmatpush1.bf16.xpose.msra.mxu1 %v3980_v42 }
  0xef   : > { %1775 = vmatprep.subr.bf16.mxu1 %v1251_v56  ;;  %v1154_v61 = vpop.permute.xlu1 %1153  ;;  %1899 = vmatpush1.bf16.xpose.msra.mxu0 %v1335_v4  ;;  %v1417_v4 = vld [vmem:[%s4700_s2 + $0x40] sm:$0xff]  ;;  %v1420_v56 = vld [vmem:[%s4700_s2 + $0x58] sm:$0xff] }
  0xf0   : > { %v1144_v16 = vpop.permute.xlu0 %1143  ;;  %1900 = vmatprep.subr.bf16.mxu0 %v4071_v19  ;;  %v1355_v27 = vsel %vm1160_vm6, %v3951_v55, %v1154_v61  ;;  %v3233_v55 = vmov 0   ;;  %v1419_v61 = vld [vmem:[%s4700_s2 + $0x50] sm:$0xff] }
  0xf1   : > { %v1347_v36 = vsel %vm1160_vm6, %v4791_v53, %v1144_v16  ;;  %3085 = vset.pattern.permute.xlu1 %v3233_v55  ;;  %3084 = vset.pattern.permute.xlu0 %v3233_v55  ;;  %v4795_v16 = vld [vmem:[#allocation17_spill] sm:$0xff]  ;;  %v893_v53 = vrot.slane %v3837_v34, 5 }
  0xf2   : > { %1427 = vperm.xlu0 %3084, %v1409_v18   ;;  %v3128_v18 = vld [vmem:[%s4699_s1 + $0x54] ss:$20 sps:$4 sm:$0xff]  }
  0xf3   : > { %v1092_v20 = vpop.permute.xlu1 %1091 }
  0xf4   : > { %v1255_v62 = vsel %vm1160_vm6, %v4786_v52, %v1092_v20 }
  0xf5   : > { %v1156_v6 = vpop.permute.xlu0 %1155 }
  0xf6   : > { %1776 = vmatpush1.bf16.xpose.msra.mxu1 %v3990_v1  ;;  %v2747_v1 = vcombine.low %v3828_v50, %v3837_v34  ;;  %v3116_v34 = vld [vmem:[%s4699_s1] ss:$20 sps:$4 sm:$0xff]  }
  0xf7   : > { %1777 = vmatprep.subr.bf16.mxu1 %v1255_v62  ;;  %1901 = vmatpush1.bf16.xpose.msra.mxu0 %v1339_v23  ;;  %v1146_v46 = vpop.permute.xlu1 %1145  ;;  %v1733_v62 = vsel %vm1160_vm6, %v4781_v59, 0  ;;  %v1422_v23 = vld [vmem:[%s4700_s2 + $0x68] sm:$0xff] }
  0xf8   : > { %1902 = vmatprep.subr.bf16.mxu0 %v4081_v31  ;;  %v1359_v35 = vsel %vm1160_vm6, %v2747_v1, %v1156_v6  ;;  %v1351_v58 = vsel %vm1160_vm6, %v3870_v43, %v1146_v46  ;;  %v1412_v43 = vld [vmem:[%s4700_s2 + $0x18] sm:$0xff]  ;;  %v1421_v6 = vld [vmem:[%s4700_s2 + $0x60] sm:$0xff]  ;;  %v1423_v46 = vld [vmem:[%s4700_s2 + $0x70] sm:$0xff] }
  0xf9   : > { %v1094_v42 = vpop.permute.xlu0 %1093  ;;  %1442 = vperm.xlu0 %3084, %v1412_v43   ;;  %v3130_v43 = vld [vmem:[%s4699_s1 + $0x50] ss:$20 sps:$4 sm:$0xff]  }
  0xfa   : > { %v1259_v2 = vsel %vm1160_vm6, %v4788_v3, %v1094_v42  ;;  %v1424_v42 = vld [vmem:[%s4700_s2 + $0x78] sm:$0xff] }
  0xfb   : > { %v1096_v24 = vpop.permute.xlu1 %1095 }
  0xfc   : > { %v1263_v49 = vsel %vm1160_vm6, %v4790_v11, %v1096_v24 }
  0xfd   : > { %1452 = vperm.xlu0 %3084, %v1414_v63   ;;  %v3155_v63 = vld [vmem:[%s4699_s1 + $0x88] ss:$20 sps:$4 sm:$0xff]  }
  0xfe   : > { %1778 = vmatpush1.bf16.xpose.msra.mxu1 %v3997_v51  ;;  %v1098_v51 = vpop.permute.xlu0 %1097 }
  0xff   : > { %1779 = vmatprep.subr.bf16.mxu1 %v1259_v2  ;;  %1903 = vmatpush1.bf16.xpose.msra.mxu0 %v1343_v21  ;;  %v1267_v10 = vsel %vm1160_vm6, %v4792_v13, %v1098_v51  ;;  %v1100_v14 = vpop.permute.xlu1 %1099  ;;  %v4796_v2 = vld [vmem:[#allocation19_spill] sm:$0xff]  ;;  %v1735_v21 = vsel %vm1160_vm6, %v4783_v7, 0  ;;  %v2695_v51 = vrot.slane %v3828_v50, 9 }
 0x100   : > { %1904 = vmatprep.subr.bf16.mxu0 %v1355_v27  ;;  %v1271_v57 = vsel %vm1160_vm6, %v4793_v9, %v1100_v14  ;;  %v3119_v27 = vld [vmem:[%s4699_s1 + $0xac] ss:$20 sps:$4 sm:$0xff]   ;;  %v3121_v7 = vld [vmem:[%s4699_s1 + $0xa8] ss:$20 sps:$4 sm:$0xff]   ;;  %v1743_v14 = vsel %vm1160_vm6, %v4790_v11, 0 }
 0x101   : > { %1462 = vperm.xlu0 %3084, %v1416_v60   ;;  %v3122_v50 = vld [vmem:[%s4699_s1 + $0x2c] ss:$20 sps:$4 sm:$0xff]   ;;  %v3150_v60 = vld [vmem:[%s4699_s1 + $0xf0] ss:$20 sps:$4 sm:$0xff]  }
 0x102   : > { %v1102_v8 = vpop.permute.xlu0 %1101  ;;  %v3136_v11 = vld [vmem:[%s4699_s1 + $0x78] ss:$20 sps:$4 sm:$0xff]  }
 0x103   : > { %v1275_v37 = vsel %vm1160_vm6, %v4794_v17, %v1102_v8  ;;  %v1104_v12 = vpop.permute.xlu1 %1103  ;;  %v3148_v8 = vld [vmem:[%s4699_s1 + $0xf4] ss:$20 sps:$4 sm:$0xff]  }
 0x104   : > { %v1279_v20 = vsel %vm1160_vm6, %v4795_v16, %v1104_v12 }
 0x105   : > { %1472 = vperm.xlu0 %3084, %v1418_v48  }
 0x106   : > { %1780 = vmatpush1.bf16.xpose.msra.mxu1 %v4004_v54  ;;  %v1410_v54 = vld [vmem:[%s4700_s2 + $0x8] sm:$0xff]  ;;  %v1106_v59 = vpop.permute.xlu0 %1105 }
 0x107   : > { %1781 = vmatprep.subr.bf16.mxu1 %v1263_v49  ;;  %1905 = vmatpush1.bf16.xpose.msra.mxu0 %v1347_v36  ;;  %v1283_v26 = vsel %vm1160_vm6, %v4796_v2, %v1106_v59  ;;  %v1108_v24 = vpop.permute.xlu1 %1107  ;;  %v1737_v49 = vsel %vm1160_vm6, %v4785_v40, 0  ;;  %v3127_v36 = vld [vmem:[%s4699_s1 + $0xd0] ss:$20 sps:$4 sm:$0xff]  }
 0x108   : > { %1906 = vmatprep.subr.bf16.mxu0 %v1359_v35  ;;  %1432 = vperm.xlu1 %3085, %v1410_v54   ;;  %v1287_v1 = vsel %vm1160_vm6, %v3868_v5, %v1108_v24  ;;  %v3131_v40 = vld [vmem:[%s4699_s1 + $0xfc] ss:$20 sps:$4 sm:$0xff]  }
 0x109   : > { %1482 = vperm.xlu0 %3084, %v1420_v56   ;;  %v4797_v35 = vld [vmem:[#allocation20_spill] sm:$0xff] }
 0x10a   : > { %v896_v55 = vrot.slane %v4797_v35, 5  ;;  %v3143_v54 = vld [vmem:[%s4699_s1 + $0x10] ss:$20 sps:$4 sm:$0xff]  }
 0x10c   : > { %1437 = vperm.xlu1 %3085, %v1411_v30   ;;  %v3147_v30 = vld [vmem:[%s4699_s1 + $0x38] ss:$20 sps:$4 sm:$0xff]  }
 0x10d   : > { %1492 = vperm.xlu0 %3084, %v1422_v23  }
 0x10e   : > { %1782 = vmatpush1.bf16.xpose.msra.mxu1 %v4019_v29  ;;  %v3104_v29 = vld [vmem:[%s4699_s1 + $0x8] ss:$20 sps:$4 sm:$0xff]  }
 0x10f   : > { %1783 = vmatprep.subr.bf16.mxu1 %v1267_v10  ;;  %1907 = vmatpush1.bf16.xpose.msra.mxu0 %v1351_v58  ;;  %v1741_v10 = vsel %vm1160_vm6, %v4788_v3, 0  ;;  %v3139_v3 = vld [vmem:[%s4699_s1 + $0x120] ss:$20 sps:$4 sm:$0xff]  }
 0x110   : > { %3065 = vmatprep.subr.msk.bf16.mxu0 %vm1160_vm6, %v4792_v13  ;;  %1447 = vperm.xlu1 %3085, %v1413_v45   ;;  %v895_v13 = vrot.slane %v893_v53, 4  ;;  %v3146_v45 = vld [vmem:[%s4699_s1 + $0xc8] ss:$20 sps:$4 sm:$0xff]  }
 0x111   : > { %1502 = vperm.xlu0 %3084, %v1424_v42  }
 0x114   : > { %1457 = vperm.xlu1 %3085, %v1415_v0   ;;  %v3152_v0 = vld [vmem:[%s4699_s1 + $0x11c] ss:$20 sps:$4 sm:$0xff]  }
 0x116   : > { %1784 = vmatpush1.bf16.xpose.msra.mxu1 %v4030_v33  ;;  %1909 = vmatmul.mubr.bf16.vlgmr.msra.gmra.mrb[0].mxu0 %v3104_v29  ;;  %v3109_v33 = vld [vmem:[%s4699_s1 + $0x30] ss:$20 sps:$4 sm:$0xff]  }
 0x117   : > { %1785 = vmatprep.subr.bf16.mxu1 %v1271_v57  ;;  %2818 = vmatpush3.bf16.xpose.msra.mxu0 %v1729_v41  ;;  %v3134_v29 = vld [vmem:[%s4699_s1 + $0x7c] ss:$20 sps:$4 sm:$0xff]   ;;  %v3151_v57 = vld [vmem:[%s4699_s1 + $0x60] ss:$20 sps:$4 sm:$0xff]  }
 0x118   : > { %1918 = vmatprep.mubr.bf16.mxu0 %v3107_v47  ;;  %3066 = vmatprep.subr.msk.bf16.mxu0 %vm1160_vm6, %v4793_v9  ;;  %v3140_v9 = vld [vmem:[%s4699_s1 + $0xa4] ss:$20 sps:$4 sm:$0xff]   ;;  %v3142_v41 = vld [vmem:[%s4699_s1 + $0xa0] ss:$20 sps:$4 sm:$0xff]  }
 0x119   : > { %1467 = vperm.xlu1 %3085, %v1417_v4   ;;  %v3144_v47 = vld [vmem:[%s4699_s1 + $0xcc] ss:$20 sps:$4 sm:$0xff]  }
 0x11d   : > { %1477 = vperm.xlu1 %3085, %v1419_v61  }
 0x11e   : > { %1786 = vmatpush1.bf16.xpose.msra.mxu1 %v4039_v44  ;;  %1919 = vmatmul.mubr.bf16.gmra.mrb[4].mxu0 %v3109_v33  ;;  %v3112_v44 = vld [vmem:[%s4699_s1 + $0x58] ss:$20 sps:$4 sm:$0xff]   ;;  %v3156_v33 = vld [vmem:[%s4699_s1 + $0xb0] ss:$20 sps:$4 sm:$0xff]  }
 0x11f   : > { %1787 = vmatprep.subr.bf16.mxu1 %v1275_v37  ;;  %2820 = vmatpush3.bf16.xpose.msra.mxu0 %v1731_v25  ;;  %v3154_v37 = vld [vmem:[%s4699_s1 + $0x118] ss:$20 sps:$4 sm:$0xff]   ;;  %v3158_v25 = vld [vmem:[%s4699_s1 + $0x100] ss:$20 sps:$4 sm:$0xff]  }
 0x120   : > { %1928 = vmatprep.mubr.bf16.mxu0 %v3110_v32  ;;  %3067 = vmatprep.subr.msk.bf16.mxu0 %vm1160_vm6, %v4794_v17  ;;  %v3157_v17 = vld [vmem:[%s4699_s1 + $0xd8] ss:$20 sps:$4 sm:$0xff]   ;;  %v3159_v32 = vld [vmem:[%s4699_s1 + $0x128] ss:$20 sps:$4 sm:$0xff]  }
 0x121   : > { %1487 = vperm.xlu1 %3085, %v1421_v6  }
 0x125   : > { %1497 = vperm.xlu1 %3085, %v1423_v46  }
 0x126   : > { %1788 = vmatpush1.bf16.xpose.msra.mxu1 %v4049_v22  ;;  %1929 = vmatmul.mubr.bf16.gmra.mrb[8].mxu0 %v3112_v44  ;;  %v3115_v22 = vld [vmem:[%s4699_s1 + $0x80] ss:$20 sps:$4 sm:$0xff]  }
 0x127   : > { %1789 = vmatprep.subr.bf16.mxu1 %v1279_v20  ;;  %2822 = vmatpush3.bf16.xpose.msra.mxu0 %v1733_v62 }
 0x128   : > { %1938 = vmatprep.mubr.bf16.mxu0 %v3113_v38  ;;  %3068 = vmatprep.subr.msk.bf16.mxu0 %vm1160_vm6, %v4795_v16 }
 0x12e   : > { %1790 = vmatpush1.bf16.xpose.msra.mxu1 %v4059_v39  ;;  %1939 = vmatmul.mubr.bf16.gmra.mrb[12].mxu0 %v3115_v22  ;;  %v3125_v39 = vld [vmem:[%s4699_s1 + $0xd4] ss:$20 sps:$4 sm:$0xff]  }
 0x12f   : > { %1791 = vmatprep.subr.bf16.mxu1 %v1283_v26  ;;  %2824 = vmatpush3.bf16.xpose.msra.mxu0 %v1735_v21 }
 0x130   : > { %1948 = vmatprep.mubr.bf16.mxu0 %v3119_v27  ;;  %3069 = vmatprep.subr.msk.bf16.mxu0 %vm1160_vm6, %v4796_v2 }
 0x136   : > { %1792 = vmatpush1.bf16.xpose.msra.mxu1 %v4071_v19  ;;  %1949 = vmatmul.mubr.bf16.gmra.mrb[16].mxu0 %v3121_v7  ;;  %v1739_v19 = vsel %vm1160_vm6, %v4786_v52, 0  ;;  %v897_v52 = vsel %vm3313_vm4, %v895_v13, %v896_v55 }
 0x137   : > { %1793 = vmatprep.subr.bf16.mxu1 %v1287_v1  ;;  %2826 = vmatpush3.bf16.xpose.msra.mxu0 %v1737_v49 }
 0x138   : > { %1958 = vmatprep.mubr.bf16.mxu0 %v3125_v39  ;;  %3070 = vmatprep.subr.msk.bf16.mxu0 %vm1160_vm6, %v3868_v5  ;;  %v894_v5 = vsel %vm3313_vm4, %v2695_v51, %v893_v53 }
 0x139   : > { %v2749_v58 = vcombine.low %v894_v5, %v897_v52 }
 0x13e   : > { %1794 = vmatpush1.bf16.xpose.msra.mxu1 %v4081_v31  ;;  %1959 = vmatmul.mubr.bf16.gmra.mrb[20].mxu0 %v3127_v36  ;;  %v3133_v31 = vld [vmem:[%s4699_s1 + $0xf8] ss:$20 sps:$4 sm:$0xff]  }
 0x13f   : > { %2828 = vmatpush3.bf16.xpose.msra.mxu0 %v1739_v19  ;;  %1968 = vmatprep.mubr.bf16.mxu0 %v3131_v40 }
 0x140   : > { %3071 = vmatprep.subr.msk.bf16.mxu0 %vm1160_vm6, %v3895_v15  ;;  %v3137_v15 = vld [vmem:[%s4699_s1 + $0x124] ss:$20 sps:$4 sm:$0xff]  }
 0x145   : > { %1796 = vmatmul.mubr.bf16.vlgmr.msra.gmra.mrb[0].mxu1 %v3116_v34 }
 0x146   : > { %1805 = vmatprep.mubr.bf16.mxu1 %v3122_v50  ;;  %1969 = vmatmul.mubr.bf16.gmra.mrb[24].mxu0 %v3133_v31 }
 0x147   : > { %2830 = vmatpush3.bf16.xpose.msra.mxu0 %v1741_v10  ;;  %1978 = vmatprep.mubr.bf16.mxu0 %v3137_v15 }
 0x148   : > { %3072 = vmatprep.subr.msk.bf16.mxu0 %vm1160_vm6, %v2749_v58 }
 0x14d   : > { %1806 = vmatmul.mubr.bf16.gmra.mrb[4].mxu1 %v3124_v28 }
 0x14e   : > { %1815 = vmatprep.mubr.bf16.mxu1 %v3128_v18  ;;  %1979 = vmatmul.mubr.bf16.gmra.mrb[28].mxu0 %v3139_v3 }
 0x14f   : > { %2832 = vmatpush3.bf16.xpose.msra.mxu0 %v1743_v14  ;;  %2833 = vmatprep.mubr.msk.bf16.mxu0 %vm1160_vm6, %v3143_v54 }
 0x155   : > { %1816 = vmatmul.mubr.bf16.gmra.mrb[8].mxu1 %v3130_v43 }
 0x156   : > { %1825 = vmatprep.mubr.bf16.mxu1 %v3134_v29  ;;  %2834 = vmatmul.mubr.msk.bf16.vlgmr.msra.gmra.mrb[0].mxu0 %vm1160_vm6, %v3143_v54 }
 0x157   : > { %2835 = vmatprep.mubr.msk.bf16.mxu0 %vm1160_vm6, %v3147_v30 }
 0x15d   : > { %1826 = vmatmul.mubr.bf16.gmra.mrb[12].mxu1 %v3136_v11 }
 0x15e   : > { %1835 = vmatprep.mubr.bf16.mxu1 %v3140_v9  ;;  %2836 = vmatmul.mubr.msk.bf16.gmra.mrb[4].mxu0 %vm1160_vm6, %v3147_v30 }
 0x15f   : > { %2837 = vmatprep.mubr.msk.bf16.mxu0 %vm1160_vm6, %v3151_v57 }
 0x165   : > { %1836 = vmatmul.mubr.bf16.gmra.mrb[16].mxu1 %v3142_v41 }
 0x166   : > { %1845 = vmatprep.mubr.bf16.mxu1 %v3144_v47  ;;  %2838 = vmatmul.mubr.msk.bf16.gmra.mrb[8].mxu0 %vm1160_vm6, %v3151_v57 }
 0x167   : > { %2839 = vmatprep.mubr.msk.bf16.mxu0 %vm1160_vm6, %v3155_v63 }
 0x16d   : > { %1846 = vmatmul.mubr.bf16.gmra.mrb[20].mxu1 %v3146_v45 }
 0x16e   : > { %1855 = vmatprep.mubr.bf16.mxu1 %v3148_v8  ;;  %2840 = vmatmul.mubr.msk.bf16.gmra.mrb[12].mxu0 %vm1160_vm6, %v3155_v63 }
 0x16f   : > { %2841 = vmatprep.mubr.msk.bf16.mxu0 %vm1160_vm6, %v3156_v33 }
 0x171   : > { %v1428_v20 = vpop.permute.xlu0 %1427 }
 0x175   : > { %1856 = vmatmul.mubr.bf16.gmra.mrb[24].mxu1 %v3150_v60 }
 0x176   : > { %1865 = vmatprep.mubr.bf16.mxu1 %v3152_v0  ;;  %2842 = vmatmul.mubr.msk.bf16.gmra.mrb[16].mxu0 %vm1160_vm6, %v3156_v33 }
 0x177   : > { %2843 = vmatprep.mubr.msk.bf16.mxu0 %vm1160_vm6, %v3157_v17 }
 0x178   : > { %v1443_v51 = vpop.permute.xlu0 %1442 }
 0x17c   : > { %v1453_v60 = vpop.permute.xlu0 %1452 }
 0x17d   : > { %1866 = vmatmul.mubr.bf16.gmra.mrb[28].mxu1 %v3154_v37 }
 0x17e   : > { %2844 = vmatmul.mubr.msk.bf16.gmra.mrb[20].mxu0 %vm1160_vm6, %v3157_v17 }
 0x17f   : > { %2845 = vmatprep.mubr.msk.bf16.mxu0 %vm1160_vm6, %v3158_v25 }
 0x186   : > { %2846 = vmatmul.mubr.msk.bf16.gmra.mrb[24].mxu0 %vm1160_vm6, %v3158_v25 }
 0x187   : > { %2847 = vmatprep.mubr.msk.bf16.mxu0 %vm1160_vm6, %v3159_v32  ;;  %v1433_v38 = vpop.permute.xlu1 %1432 }
 0x18b   : > { %v1438_v59 = vpop.permute.xlu1 %1437 }
 0x18e   : > { %2848 = vmatmul.mubr.msk.bf16.gmra.mrb[28].mxu0 %vm1160_vm6, %v3159_v32 }
 0x18f   : > { %v1448_v9 = vpop.permute.xlu1 %1447 }
 0x218   : > { %v1797_v48 = vpop.f32.mrb[0].mxu1 }
 0x219   : > { %v1799_v4 = vpop.f32.mrb[1].mxu1  ;;  %v1798_v23 = vadd.f32 %v1797_v48, %v1428_v20 }
 0x21a   : > { %v1801_v12 = vpop.f32.mrb[2].mxu1  ;;  %v1800_v6 = vadd.f32 %v1799_v4, %v1428_v20 }
 0x21b   : > { %v1803_v44 = vpop.f32.mrb[3].mxu1  ;;  %v1802_v2 = vadd.f32 %v1801_v12, %v1433_v38 }
 0x21c   : > { %v1804_v24 = vadd.f32 %v1803_v44, %v1433_v38 }
 0x220   : > { %v1807_v56 = vpop.f32.mrb[4].mxu1 }
 0x221   : > { %v1809_v61 = vpop.f32.mrb[5].mxu1  ;;  %v1808_v35 = vadd.f32 %v1807_v56, %v1438_v59 }
 0x222   : > { %v1811_v16 = vpop.f32.mrb[6].mxu1  ;;  %v1810_v13 = vadd.f32 %v1809_v61, %v1438_v59 }
 0x223   : > { %v1813_v62 = vpop.f32.mrb[7].mxu1  ;;  %v1812_v10 = vadd.f32 %v1811_v16, %v1443_v51 }
 0x224   : > { %v1814_v3 = vadd.f32 %v1813_v62, %v1443_v51 }
 0x228   : > { %v1817_v22 = vpop.f32.mrb[8].mxu1 }
 0x229   : > { %v1819_v42 = vpop.f32.mrb[9].mxu1  ;;  %v2023_v46 = vpop.f32.mrb[0].mxu0  ;;  %v1818_v47 = vadd.f32 %v1817_v22, %v1448_v9 }
 0x22a   : > { %v1821_v26 = vpop.f32.mrb[10].mxu1  ;;  %v4337_v21 = vadd.f32 %v2023_v46, %v1798_v23  ;;  %v2025_v27 = vpop.f32.mrb[1].mxu0  ;;  %v1820_v45 = vadd.f32 %v1819_v42, %v1448_v9 }
 0x22b   : > { %v1823_v7 = vpop.f32.mrb[11].mxu1  ;;  %v4339_v1 = vadd.f32 %v2025_v27, %v1800_v6  ;;  %v2027_v49 = vpop.f32.mrb[2].mxu0  ;;  %v1822_v32 = vadd.f32 %v1821_v26, %v1453_v60 }
 0x22c   : > { %v2102_v39 = vmax.f32 %v4337_v21, 0.0  ;;  %v4342_v53 = vadd.f32 %v2027_v49, %v1802_v2  ;;  %v2029_v36 = vpop.f32.mrb[3].mxu0  ;;  %v1824_v44 = vadd.f32 %v1823_v7, %v1453_v60  ;;  %v1458_v23 = vpop.permute.xlu1 %1457 }
 0x22d   : > { %v2103_v40 = vmax.f32 %v4339_v1, 0.0  ;;  %v4345_v19 = vadd.f32 %v2029_v36, %v1804_v24  ;;  %v1463_v27 = vpop.permute.xlu0 %1462 }
 0x22e   : > { %v2104_v55 = vmax.f32 %v4342_v53, 0.0 }
 0x22f   : > { %v2105_v34 = vmax.f32 %v4345_v19, 0.0  ;;  %v2134_v5 = vadd.f32 %v2103_v40, %v2102_v39 }
 0x230   : > { %v1827_v52 = vpop.f32.mrb[12].mxu1 }
 0x231   : > { %v1829_v50 = vpop.f32.mrb[13].mxu1  ;;  %v2033_v31 = vpop.f32.mrb[4].mxu0  ;;  %2135 = vadd.xlane.f32.xlu1 %v2134_v5  ;;  %v2137_v15 = vadd.f32 %v2105_v34, %v2104_v55  ;;  %v1828_v22 = vadd.f32 %v1827_v52, %v1458_v23 }
 0x232   : > { %v1831_v58 = vpop.f32.mrb[14].mxu1  ;;  %v4357_v28 = vadd.f32 %v2033_v31, %v1808_v35  ;;  %v2035_v18 = vpop.f32.mrb[5].mxu0  ;;  %v1830_v46 = vadd.f32 %v1829_v50, %v1458_v23 }
 0x233   : > { %v1833_v54 = vpop.f32.mrb[15].mxu1  ;;  %v4359_v14 = vadd.f32 %v2035_v18, %v1810_v13  ;;  %v2037_v43 = vpop.f32.mrb[6].mxu0  ;;  %2138 = vadd.xlane.f32.xlu0 %v2137_v15  ;;  %v1832_v35 = vadd.f32 %v1831_v58, %v1463_v27 }
 0x234   : > { %v2106_v29 = vmax.f32 %v4357_v28, 0.0  ;;  %v4362_v30 = vadd.f32 %v2037_v43, %v1812_v10  ;;  %v2039_v11 = vpop.f32.mrb[7].mxu0  ;;  %v1834_v52 = vadd.f32 %v1833_v54, %v1463_v27  ;;  %v1468_v43 = vpop.permute.xlu1 %1467 }
 0x235   : > { %v2107_v57 = vmax.f32 %v4359_v14, 0.0  ;;  %v4365_v41 = vadd.f32 %v2039_v11, %v1814_v3 }
 0x236   : > { %v2108_v63 = vmax.f32 %v4362_v30, 0.0 }
 0x237   : > { %v2109_v8 = vmax.f32 %v4365_v41, 0.0  ;;  %v2140_v33 = vadd.f32 %v2107_v57, %v2106_v29 }
 0x238   : > { %v1837_v0 = vpop.f32.mrb[16].mxu1 }
 0x239   : > { %v1839_v17 = vpop.f32.mrb[17].mxu1  ;;  %v2043_v37 = vpop.f32.mrb[8].mxu0  ;;  %2141 = vadd.xlane.f32.xlu0 %v2140_v33  ;;  %v2143_v25 = vadd.f32 %v2109_v8, %v2108_v63  ;;  %v1838_v58 = vadd.f32 %v1837_v0, %v1468_v43 }
 0x23a   : > { %v1841_v48 = vpop.f32.mrb[18].mxu1  ;;  %v4377_v4 = vadd.f32 %v2043_v37, %v1818_v47  ;;  %v2045_v12 = vpop.f32.mrb[9].mxu0  ;;  %v1840_v37 = vadd.f32 %v1839_v17, %v1468_v43 }
 0x23b   : > { %v1843_v56 = vpop.f32.mrb[19].mxu1  ;;  %v4379_v61 = vadd.f32 %v2045_v12, %v1820_v45  ;;  %v2047_v16 = vpop.f32.mrb[10].mxu0  ;;  %2144 = vadd.xlane.f32.xlu1 %v2143_v25 }
 0x23c   : > { %v2110_v20 = vmax.f32 %v4377_v4, 0.0  ;;  %v4382_v62 = vadd.f32 %v2047_v16, %v1822_v32  ;;  %v2049_v38 = vpop.f32.mrb[11].mxu0  ;;  %v1473_v33 = vpop.permute.xlu0 %1472 }
 0x23d   : > { %v2111_v6 = vmax.f32 %v4379_v61, 0.0  ;;  %v4385_v59 = vadd.f32 %v2049_v38, %v1824_v44  ;;  %v1842_v12 = vadd.f32 %v1841_v48, %v1473_v33  ;;  %v1844_v23 = vadd.f32 %v1843_v56, %v1473_v33 }
 0x23e   : > { %v2112_v42 = vmax.f32 %v4382_v62, 0.0 }
 0x23f   : > { %v4755_v2 = vmax.f32 %v4385_v59, 0.0  ;;  %v2146_v26 = vadd.f32 %v2111_v6, %v2110_v20  ;;  %v4798_v30 = vmax.f32 %v4385_v59, 0.0 }
 0x240   : > { %v1847_v24 = vpop.f32.mrb[20].mxu1 }
 0x241   : > { %v1849_v7 = vpop.f32.mrb[21].mxu1  ;;  %v2053_v49 = vpop.f32.mrb[12].mxu0  ;;  %2147 = vadd.xlane.f32.xlu0 %v2146_v26  ;;  %v2149_v36 = vadd.f32 %v4755_v2, %v2112_v42 }
 0x242   : > { %v1851_v51 = vpop.f32.mrb[22].mxu1  ;;  %v4397_v13 = vadd.f32 %v2053_v49, %v1828_v22  ;;  %v2055_v5 = vpop.f32.mrb[13].mxu0 }
 0x243   : > { %v1853_v50 = vpop.f32.mrb[23].mxu1  ;;  %v4399_v31 = vadd.f32 %v2055_v5, %v1830_v46  ;;  %v2057_v15 = vpop.f32.mrb[14].mxu0  ;;  %2150 = vadd.xlane.f32.xlu1 %v2149_v36 }
 0x244   : > { %v4752_v10 = vmax.f32 %v4397_v13, 0.0  ;;  %v4402_v18 = vadd.f32 %v2057_v15, %v1832_v35  ;;  %v2059_v3 = vpop.f32.mrb[15].mxu0  ;;  %v1478_v5 = vpop.permute.xlu1 %1477  ;;  %v4801_v62 = vmax.f32 %v4397_v13, 0.0 }
 0x245   : > { %v4739_v11 = vmax.f32 %v4399_v31, 0.0  ;;  %v4405_v9 = vadd.f32 %v2059_v3, %v1834_v52  ;;  %v1483_v15 = vpop.permute.xlu0 %1482  ;;  %v1848_v3 = vadd.f32 %v1847_v24, %v1478_v5  ;;  %v4802_v59 = vmax.f32 %v4399_v31, 0.0 }
 0x246   : > { %v4754_v47 = vmax.f32 %v4402_v18, 0.0 }
 0x247   : > { %v4753_v54 = vmax.f32 %v4405_v9, 0.0  ;;  %v2152_v45 = vadd.f32 %v4739_v11, %v4752_v10  ;;  %v4800_v4 = vmax.f32 %v4405_v9, 0.0 }
 0x248   : > { %v1857_v60 = vpop.f32.mrb[24].mxu1 }
 0x249   : > { %v1859_v25 = vpop.f32.mrb[25].mxu1  ;;  %v2063_v32 = vpop.f32.mrb[16].mxu0  ;;  %2153 = vadd.xlane.f32.xlu0 %v2152_v45  ;;  %v2155_v0 = vadd.f32 %v4753_v54, %v4754_v47 }
 0x24a   : > { %v1861_v44 = vpop.f32.mrb[26].mxu1  ;;  %v4417_v16 = vadd.f32 %v2063_v32, %v1838_v58  ;;  %v2065_v38 = vpop.f32.mrb[17].mxu0  ;;  %v1850_v58 = vadd.f32 %v1849_v7, %v1478_v5  ;;  %v1852_v32 = vadd.f32 %v1851_v51, %v1483_v15 }
 0x24b   : > { %v1863_v22 = vpop.f32.mrb[27].mxu1  ;;  %v4419_v46 = vadd.f32 %v2065_v38, %v1840_v37  ;;  %v2067_v26 = vpop.f32.mrb[18].mxu0  ;;  %2156 = vadd.xlane.f32.xlu1 %v2155_v0 }
 0x24c   : > { %v4736_v17 = vmax.f32 %v4417_v16, 0.0  ;;  %v4422_v27 = vadd.f32 %v2067_v26, %v1842_v12  ;;  %v2069_v49 = vpop.f32.mrb[19].mxu0 }
 0x24d   : > { %v4735_v36 = vmax.f32 %v4419_v46, 0.0  ;;  %v4425_v35 = vadd.f32 %v2069_v49, %v1844_v23  ;;  %v1854_v23 = vadd.f32 %v1853_v50, %v1483_v15 }
 0x24e   : > { %v4738_v48 = vmax.f32 %v4422_v27, 0.0 }
 0x24f   : > { %v4737_v52 = vmax.f32 %v4425_v35, 0.0  ;;  %v2158_v56 = vadd.f32 %v4735_v36, %v4736_v17 }
 0x250   : > { %v1867_v43 = vpop.f32.mrb[28].mxu1 }
 0x251   : > { %v1869_v45 = vpop.f32.mrb[29].mxu1  ;;  %v2073_v33 = vpop.f32.mrb[20].mxu0  ;;  %2159 = vadd.xlane.f32.xlu0 %v2158_v56  ;;  %v2161_v37 = vadd.f32 %v4737_v52, %v4738_v48 }
 0x252   : > { %v1871_v0 = vpop.f32.mrb[30].mxu1  ;;  %v4437_v12 = vadd.f32 %v2073_v33, %v1848_v3  ;;  %v2075_v38 = vpop.f32.mrb[21].mxu0 }
 0x253   : > { %v1873_v26 = vpop.f32.mrb[31].mxu1  ;;  %v4439_v49 = vadd.f32 %v2075_v38, %v1850_v58  ;;  %v2077_v24 = vpop.f32.mrb[22].mxu0  ;;  %2162 = vadd.xlane.f32.xlu1 %v2161_v37 }
 0x254   : > { %v4741_v7 = vmax.f32 %v4437_v12, 0.0  ;;  %v4442_v5 = vadd.f32 %v2077_v24, %v1852_v32  ;;  %v2079_v56 = vpop.f32.mrb[23].mxu0  ;;  %v1488_v3 = vpop.permute.xlu1 %1487 }
 0x255   : > { %v4740_v36 = vmax.f32 %v4439_v49, 0.0  ;;  %v4445_v17 = vadd.f32 %v2079_v56, %v1854_v23  ;;  %v1858_v15 = vadd.f32 %v1857_v60, %v1488_v3  ;;  %v1493_v58 = vpop.permute.xlu0 %1492  ;;  %v1860_v37 = vadd.f32 %v1859_v25, %v1488_v3 }
 0x256   : > { %v4743_v51 = vmax.f32 %v4442_v5, 0.0  ;;  %v1862_v23 = vadd.f32 %v1861_v44, %v1493_v58  ;;  %v1864_v52 = vadd.f32 %v1863_v22, %v1493_v58 }
 0x257   : > { %v4742_v33 = vmax.f32 %v4445_v17, 0.0  ;;  %v2164_v50 = vadd.f32 %v4740_v36, %v4741_v7 }
 0x258   : > { %v1498_v3 = vpop.permute.xlu1 %1497 }
 0x259   : > { %v2083_v32 = vpop.f32.mrb[24].mxu0  ;;  %2165 = vadd.xlane.f32.xlu0 %v2164_v50  ;;  %v2167_v38 = vadd.f32 %v4742_v33, %v4743_v51  ;;  %v1868_v58 = vadd.f32 %v1867_v43, %v1498_v3 }
 0x25a   : > { %v4457_v24 = vadd.f32 %v2083_v32, %v1858_v15  ;;  %v2085_v56 = vpop.f32.mrb[25].mxu0  ;;  %v1503_v15 = vpop.permute.xlu0 %1502 }
 0x25b   : > { %v4459_v48 = vadd.f32 %v2085_v56, %v1860_v37  ;;  %v2087_v11 = vpop.f32.mrb[26].mxu0  ;;  %2168 = vadd.xlane.f32.xlu1 %v2167_v38  ;;  %v1870_v37 = vadd.f32 %v1869_v45, %v1498_v3  ;;  %v1872_v38 = vadd.f32 %v1871_v0, %v1503_v15 }
 0x25c   : > { %v4745_v60 = vmax.f32 %v4457_v24, 0.0  ;;  %v4462_v36 = vadd.f32 %v2087_v11, %v1862_v23  ;;  %v2089_v25 = vpop.f32.mrb[27].mxu0 }
 0x25d   : > { %v4744_v50 = vmax.f32 %v4459_v48, 0.0  ;;  %v4465_v7 = vadd.f32 %v2089_v25, %v1864_v52  ;;  %v1874_v25 = vadd.f32 %v1873_v26, %v1503_v15  ;;  %v2198_v15 = vld [vmem:[%s4701_s3] sm:$0xff] }
 0x25e   : > { %v4751_v44 = vmax.f32 %v4462_v36, 0.0  ;;  %2913 = vmatprep.mubr.f32.mxu1 %v2198_v15 }
 0x25f   : > { %v4750_v32 = vmax.f32 %v4465_v7, 0.0  ;;  %v2170_v22 = vadd.f32 %v4744_v50, %v4745_v60 }
 0x261   : > { %v2093_v11 = vpop.f32.mrb[28].mxu0  ;;  %2171 = vadd.xlane.f32.xlu0 %v2170_v22  ;;  %v2173_v52 = vadd.f32 %v4750_v32, %v4751_v44 }
 0x262   : > { %v4477_v23 = vadd.f32 %v2093_v11, %v1868_v58  ;;  %v2095_v56 = vpop.f32.mrb[29].mxu0 }
 0x263   : > { %v4479_v33 = vadd.f32 %v2095_v56, %v1870_v37  ;;  %v2097_v51 = vpop.f32.mrb[30].mxu0  ;;  %2174 = vadd.xlane.f32.xlu1 %v2173_v52 }
 0x264   : > { %v4747_v50 = vmax.f32 %v4477_v23, 0.0  ;;  %v4482_v43 = vadd.f32 %v2097_v51, %v1872_v38  ;;  %v2099_v45 = vpop.f32.mrb[31].mxu0 }
 0x265   : > { %v4746_v3 = vmax.f32 %v4479_v33, 0.0  ;;  %v4485_v22 = vadd.f32 %v2099_v45, %v1874_v25 }
 0x266   : > { %v4749_v60 = vmax.f32 %v4482_v43, 0.0 }
 0x267   : > { %v4748_v0 = vmax.f32 %v4485_v22, 0.0  ;;  %v2176_v26 = vadd.f32 %v4746_v3, %v4747_v50 }
 0x269   : > { %2177 = vadd.xlane.f32.xlu0 %v2176_v26  ;;  %v2179_v51 = vadd.f32 %v4748_v0, %v4749_v60 }
 0x26b   : > { %2180 = vadd.xlane.f32.xlu1 %v2179_v51 }
 0x2be   : > { %v2136_v58 = vpop.xlane.xlu1 %2135 }
 0x2bf   : > { %v2182_v11 = vmul.f32 0.00390625, %v2136_v58 }
 0x2c0   : > { %v2139_v37 = vpop.xlane.xlu0 %2138 }
 0x2c1   : > { %v2183_v52 = vmul.f32 0.00390625, %v2139_v37 }
 0x2c3   : > { %v2937_v38 = vpack.c.bf16 %v2183_v52, %v2182_v11 }
 0x2c5   : > { %2938 = vmatprep.subr.bf16.mxu1 %v2937_v38 }
 0x2c6   : > { %v2142_v56 = vpop.xlane.xlu0 %2141  ;;  %2940 = vmatpush3.bf16.msra.mxu1 %v2937_v38 }
 0x2c7   : > { %v2184_v45 = vmul.f32 0.00390625, %v2142_v56 }
 0x2c8   : > { %v2145_v25 = vpop.xlane.xlu1 %2144 }
 0x2c9   : > { %v2185_v26 = vmul.f32 0.00390625, %v2145_v25 }
 0x2cb   : > { %v2941_v3 = vpack.c.bf16 %v2185_v26, %v2184_v45 }
 0x2cd   : > { %2942 = vmatprep.subr.bf16.mxu1 %v2941_v3 }
 0x2ce   : > { %v2148_v50 = vpop.xlane.xlu0 %2147  ;;  %2944 = vmatpush3.bf16.msra.mxu1 %v2941_v3 }
 0x2cf   : > { %v2186_v0 = vmul.f32 0.00390625, %v2148_v50 }
 0x2d0   : > { %v2151_v51 = vpop.xlane.xlu1 %2150 }
 0x2d1   : > { %v2187_v60 = vmul.f32 0.00390625, %v2151_v51 }
 0x2d3   : > { %v2945_v32 = vpack.c.bf16 %v2187_v60, %v2186_v0 }
 0x2d5   : > { %2946 = vmatprep.subr.bf16.mxu1 %v2945_v32 }
 0x2d6   : > { %v2154_v15 = vpop.xlane.xlu0 %2153  ;;  %2948 = vmatpush3.bf16.msra.mxu1 %v2945_v32 }
 0x2d7   : > { %v2188_v37 = vmul.f32 0.00390625, %v2154_v15 }
 0x2d8   : > { %v2157_v58 = vpop.xlane.xlu1 %2156 }
 0x2d9   : > { %v2189_v11 = vmul.f32 0.00390625, %v2157_v58 }
 0x2db   : > { %v2949_v52 = vpack.c.bf16 %v2189_v11, %v2188_v37 }
 0x2dd   : > { %2950 = vmatprep.subr.bf16.mxu1 %v2949_v52 }
 0x2de   : > { %v2160_v38 = vpop.xlane.xlu0 %2159  ;;  %2952 = vmatpush3.bf16.msra.mxu1 %v2949_v52 }
 0x2df   : > { %v2190_v25 = vmul.f32 0.00390625, %v2160_v38 }
 0x2e0   : > { %v2163_v56 = vpop.xlane.xlu1 %2162 }
 0x2e1   : > { %v2191_v45 = vmul.f32 0.00390625, %v2163_v56 }
 0x2e3   : > { %v2953_v26 = vpack.c.bf16 %v2191_v45, %v2190_v25 }
 0x2e5   : > { %2954 = vmatprep.subr.bf16.mxu1 %v2953_v26 }
 0x2e6   : > { %v2166_v3 = vpop.xlane.xlu0 %2165  ;;  %2956 = vmatpush3.bf16.msra.mxu1 %v2953_v26  ;;  %v2199_v26 = vld [vmem:[%s4701_s3 + $0x8] sm:$0xff] }
 0x2e7   : > { %v2192_v51 = vmul.f32 0.00390625, %v2166_v3  ;;  %v2200_v3 = vld [vmem:[%s4701_s3 + $0x10] sm:$0xff] }
 0x2e8   : > { %v2169_v50 = vpop.xlane.xlu1 %2168 }
 0x2e9   : > { %v2193_v60 = vmul.f32 0.00390625, %v2169_v50  ;;  %v2201_v50 = vld [vmem:[%s4701_s3 + $0x18] sm:$0xff] }
 0x2eb   : > { %v2957_v0 = vpack.c.bf16 %v2193_v60, %v2192_v51  ;;  %v2202_v51 = vld [vmem:[%s4701_s3 + $0x20] sm:$0xff]  ;;  %v2203_v60 = vld [vmem:[%s4701_s3 + $0x28] sm:$0xff] }
 0x2ed   : > { %2958 = vmatprep.subr.bf16.mxu1 %v2957_v0 }
 0x2ee   : > { %v2172_v32 = vpop.xlane.xlu0 %2171  ;;  %2960 = vmatpush3.bf16.msra.mxu1 %v2957_v0  ;;  %v2204_v0 = vld [vmem:[%s4701_s3 + $0x30] sm:$0xff] }
 0x2ef   : > { %v2194_v58 = vmul.f32 0.00390625, %v2172_v32  ;;  %v2205_v32 = vld [vmem:[%s4701_s3 + $0x38] sm:$0xff] }
 0x2f0   : > { %v2175_v15 = vpop.xlane.xlu1 %2174 }
 0x2f1   : > { %v2195_v37 = vmul.f32 0.00390625, %v2175_v15  ;;  %v2206_v15 = vld [vmem:[%s4701_s3 + $0x40] sm:$0xff] }
 0x2f3   : > { %v2961_v11 = vpack.c.bf16 %v2195_v37, %v2194_v58  ;;  %v2207_v58 = vld [vmem:[%s4701_s3 + $0x48] sm:$0xff]  ;;  %v2208_v37 = vld [vmem:[%s4701_s3 + $0x50] sm:$0xff] }
 0x2f5   : > { %2962 = vmatprep.subr.bf16.mxu1 %v2961_v11 }
 0x2f6   : > { %v2178_v52 = vpop.xlane.xlu0 %2177  ;;  %2964 = vmatpush3.bf16.msra.mxu1 %v2961_v11  ;;  %v2209_v11 = vld [vmem:[%s4701_s3 + $0x58] sm:$0xff] }
 0x2f7   : > { %v2196_v56 = vmul.f32 0.00390625, %v2178_v52  ;;  %v2210_v52 = vld [vmem:[%s4701_s3 + $0x60] sm:$0xff] }
 0x2f8   : > { %v2181_v38 = vpop.xlane.xlu1 %2180 }
 0x2f9   : > { %v2197_v25 = vmul.f32 0.00390625, %v2181_v38  ;;  %v2211_v38 = vld [vmem:[%s4701_s3 + $0x68] sm:$0xff] }
 0x2fb   : > { %v2965_v45 = vpack.c.bf16 %v2197_v25, %v2196_v56  ;;  %v2212_v56 = vld [vmem:[%s4701_s3 + $0x70] sm:$0xff]  ;;  %v2213_v25 = vld [vmem:[%s4701_s3 + $0x78] sm:$0xff] }
 0x2fd   : > { %2966 = vmatprep.subr.bf16.mxu1 %v2965_v45 }
 0x2fe   : > { %2968 = vmatpush3.bf16.msra.mxu1 %v2965_v45  ;;  %v2215_v45 = vld [vmem:[%s4702_s4 + $0x8] sm:$0xff] }
 0x301   : > { %2914 = vmatmul.mubr.f32.vlgmr.msra.gmra.mrb[32].mxu1 %v2199_v26  ;;  %v2214_v26 = vld [vmem:[%s4702_s4] sm:$0xff] }
 0x302   : > { %2916 = vmatprep.mubr.f32.mxu1 %v2200_v3 }
 0x305   : > { %2917 = vmatmul.mubr.f32.gmra.mrb[34].mxu1 %v2201_v50 }
 0x306   : > { %2919 = vmatprep.mubr.f32.mxu1 %v2202_v51 }
 0x309   : > { %2920 = vmatmul.mubr.f32.gmra.mrb[36].mxu1 %v2203_v60 }
 0x30a   : > { %2922 = vmatprep.mubr.f32.mxu1 %v2204_v0  ;;  %v2217_v0 = vld [vmem:[%s4702_s4 + $0x18] sm:$0xff] }
 0x30d   : > { %2923 = vmatmul.mubr.f32.gmra.mrb[38].mxu1 %v2205_v32 }
 0x30e   : > { %2925 = vmatprep.mubr.f32.mxu1 %v2206_v15  ;;  %v2216_v15 = vld [vmem:[%s4702_s4 + $0x10] sm:$0xff] }
 0x311   : > { %2926 = vmatmul.mubr.f32.gmra.mrb[40].mxu1 %v2207_v58 }
 0x312   : > { %2928 = vmatprep.mubr.f32.mxu1 %v2208_v37 }
 0x315   : > { %2929 = vmatmul.mubr.f32.gmra.mrb[42].mxu1 %v2209_v11 }
 0x316   : > { %2931 = vmatprep.mubr.f32.mxu1 %v2210_v52 }
 0x319   : > { %2932 = vmatmul.mubr.f32.gmra.mrb[44].mxu1 %v2211_v38 }
 0x31a   : > { %2934 = vmatprep.mubr.f32.mxu1 %v2212_v56  ;;  %v2219_v56 = vld [vmem:[%s4702_s4 + $0x28] sm:$0xff] }
 0x31d   : > { %2935 = vmatmul.mubr.f32.gmra.mrb[46].mxu1 %v2213_v25 }
 0x3d4   : > { %v2915_v3 = vpop.f32.mrb[32].mxu1 }
 0x3d5   : > { %v2302_v50 = vadd.f32 %v2915_v3, %v2215_v45  ;;  %v2296_v51 = vpop.f32.mrb[33].mxu1  ;;  %v2218_v45 = vld [vmem:[%s4702_s4 + $0x20] sm:$0xff] }
 0x3d6   : > { %v2297_v60 = vadd.f32 %v2296_v51, %v2214_v26 }
 0x3d7   : > { %v2799_v32 = vmul.f32 -1.442695, %v2302_v50 }
 0x3d8   : > { %v2798_v58 = vmul.f32 -1.442695, %v2297_v60  ;;  %v2918_v37 = vpop.f32.mrb[34].mxu1 }
 0x3d9   : > { %3160 = vpow2.f32 %v2799_v32  ;;  %v2312_v11 = vadd.f32 %v2918_v37, %v2217_v0  ;;  %v2306_v52 = vpop.f32.mrb[35].mxu1  ;;  %v2221_v0 = vld [vmem:[%s4702_s4 + $0x38] sm:$0xff] }
 0x3da   : > { %3162 = vpow2.f32 %v2798_v58  ;;  %v2307_v38 = vadd.f32 %v2306_v52, %v2216_v15  ;;  %v2220_v15 = vld [vmem:[%s4702_s4 + $0x30] sm:$0xff] }
 0x3db   : > { %v2801_v25 = vmul.f32 -1.442695, %v2312_v11 }
 0x3dc   : > { %v2800_v26 = vmul.f32 -1.442695, %v2307_v38  ;;  %v2921_v3 = vpop.f32.mrb[36].mxu1 }
 0x3dd   : > { %3164 = vpow2.f32 %v2801_v25  ;;  %v2322_v50 = vadd.f32 %v2921_v3, %v2219_v56  ;;  %v2316_v51 = vpop.f32.mrb[37].mxu1  ;;  %v2223_v56 = vld [vmem:[%s4702_s4 + $0x48] sm:$0xff] }
 0x3de   : > { %3166 = vpow2.f32 %v2800_v26  ;;  %v2317_v60 = vadd.f32 %v2316_v51, %v2218_v45  ;;  %v2222_v26 = vld [vmem:[%s4702_s4 + $0x40] sm:$0xff] }
 0x3df   : > { %v2803_v32 = vmul.f32 -1.442695, %v2322_v50 }
 0x3e0   : > { %v2802_v58 = vmul.f32 -1.442695, %v2317_v60  ;;  %v2924_v37 = vpop.f32.mrb[38].mxu1 }
 0x3e1   : > { %3168 = vpow2.f32 %v2803_v32  ;;  %v2332_v11 = vadd.f32 %v2924_v37, %v2221_v0  ;;  %v2326_v52 = vpop.f32.mrb[39].mxu1 }
 0x3e2   : > { %3170 = vpow2.f32 %v2802_v58  ;;  %v2327_v38 = vadd.f32 %v2326_v52, %v2220_v15  ;;  %v2225_v58 = vld [vmem:[%s4702_s4 + $0x58] sm:$0xff]  ;;  %v2224_v52 = vld [vmem:[%s4702_s4 + $0x50] sm:$0xff] }
 0x3e3   : > { %v3161_v25 = vpop.eup %3160  ;;  %v2805_v45 = vmul.f32 -1.442695, %v2332_v11 }
 0x3e4   : > { %v3163_v3 = vpop.eup %3162  ;;  %v2424_v50 = vadd.f32 1.0, %v3161_v25  ;;  %v2804_v51 = vmul.f32 -1.442695, %v2327_v38  ;;  %v2927_v60 = vpop.f32.mrb[40].mxu1 }
 0x3e5   : > { %v2423_v44 = vadd.f32 1.0, %v3163_v3  ;;  %3172 = vpow2.f32 %v2805_v45  ;;  %v2342_v0 = vadd.f32 %v2927_v60, %v2223_v56  ;;  %v2336_v32 = vpop.f32.mrb[41].mxu1 }
 0x3e6   : > { %3174 = vrcp.f32 %v2424_v50  ;;  %v2337_v15 = vadd.f32 %v2336_v32, %v2222_v26 }
 0x3e7   : > { %v3165_v37 = vpop.eup %3164  ;;  %3176 = vrcp.f32 %v2423_v44  ;;  %v2807_v11 = vmul.f32 -1.442695, %v2342_v0  ;;  %v2227_v44 = vld [vmem:[%s4702_s4 + $0x68] sm:$0xff] }
 0x3e8   : > { %v3167_v25 = vpop.eup %3166  ;;  %v2426_v38 = vadd.f32 1.0, %v3165_v37  ;;  %3178 = vpow2.f32 %v2804_v51  ;;  %v2806_v3 = vmul.f32 -1.442695, %v2337_v15  ;;  %v2930_v45 = vpop.f32.mrb[42].mxu1  ;;  %v2226_v37 = vld [vmem:[%s4702_s4 + $0x60] sm:$0xff] }
 0x3e9   : > { %v2425_v56 = vadd.f32 1.0, %v3167_v25  ;;  %3180 = vpow2.f32 %v2807_v11  ;;  %v2352_v50 = vadd.f32 %v2930_v45, %v2225_v58  ;;  %v2346_v26 = vpop.f32.mrb[43].mxu1 }
 0x3ea   : > { %3182 = vrcp.f32 %v2426_v38  ;;  %v2347_v60 = vadd.f32 %v2346_v26, %v2224_v52 }
 0x3eb   : > { %v3169_v0 = vpop.eup %3168  ;;  %3184 = vrcp.f32 %v2425_v56  ;;  %v2809_v32 = vmul.f32 -1.442695, %v2352_v50  ;;  %v2229_v56 = vld [vmem:[%s4702_s4 + $0x78] sm:$0xff] }
 0x3ec   : > { %v3171_v51 = vpop.eup %3170  ;;  %v2428_v15 = vadd.f32 1.0, %v3169_v0  ;;  %3186 = vpow2.f32 %v2806_v3  ;;  %v2808_v25 = vmul.f32 -1.442695, %v2347_v60  ;;  %v2933_v11 = vpop.f32.mrb[44].mxu1  ;;  %v2228_v0 = vld [vmem:[%s4702_s4 + $0x70] sm:$0xff] }
 0x3ed   : > { %v2427_v58 = vadd.f32 1.0, %v3171_v51  ;;  %3188 = vpow2.f32 %v2809_v32  ;;  %v2362_v38 = vadd.f32 %v2933_v11, %v2227_v44  ;;  %v2356_v52 = vpop.f32.mrb[45].mxu1 }
 0x3ee   : > { %3190 = vrcp.f32 %v2428_v15  ;;  %v2357_v45 = vadd.f32 %v2356_v52, %v2226_v37 }
 0x3ef   : > { %v3173_v50 = vpop.eup %3172  ;;  %3192 = vrcp.f32 %v2427_v58  ;;  %v2811_v26 = vmul.f32 -1.442695, %v2362_v38 }
 0x3f0   : > { %v3175_v3 = vpop.eup %3174  ;;  %v2430_v60 = vadd.f32 1.0, %v3173_v50  ;;  %3194 = vpow2.f32 %v2808_v25  ;;  %v2810_v51 = vmul.f32 -1.442695, %v2357_v45  ;;  %v2936_v32 = vpop.f32.mrb[46].mxu1 }
 0x3f1   : > { %v3177_v44 = vpop.eup %3176  ;;  %3196 = vpow2.f32 %v2811_v26  ;;  %v2372_v15 = vadd.f32 %v2936_v32, %v2229_v56  ;;  %2478 = vperm.xlu1 %3085, %v3175_v3   ;;  %v2366_v37 = vpop.f32.mrb[47].mxu1 }
 0x3f2   : > { %v3179_v11 = vpop.eup %3178  ;;  %3198 = vrcp.f32 %v2430_v60  ;;  %v2367_v52 = vadd.f32 %v2366_v37, %v2228_v0  ;;  %2473 = vperm.xlu0 %3084, %v3177_v44  }
 0x3f3   : > { %v3181_v58 = vpop.eup %3180  ;;  %v2429_v38 = vadd.f32 1.0, %v3179_v11  ;;  %3200 = vpow2.f32 %v2810_v51  ;;  %v2813_v10 = vmul.f32 -1.442695, %v2372_v15 }
 0x3f4   : > { %v3183_v54 = vpop.eup %3182  ;;  %v2432_v47 = vadd.f32 1.0, %v3181_v58  ;;  %v2812_v2 = vmul.f32 -1.442695, %v2367_v52 }
 0x3f5   : > { %v3185_v50 = vpop.eup %3184  ;;  %3202 = vrcp.f32 %v2429_v38 }
 0x3f6   : > { %v3187_v25 = vpop.eup %3186  ;;  %3204 = vrcp.f32 %v2432_v47  ;;  %2483 = vperm.xlu1 %3085, %v3185_v50   ;;  %2488 = vperm.xlu0 %3084, %v3183_v54  }
 0x3f7   : > { %v3189_v45 = vpop.eup %3188  ;;  %v2431_v56 = vadd.f32 1.0, %v3187_v25  ;;  %3206 = vpow2.f32 %v2813_v10 }
 0x3f8   : > { %v3191_v26 = vpop.eup %3190  ;;  %v2434_v3 = vadd.f32 1.0, %v3189_v45  ;;  %3208 = vpow2.f32 %v2812_v2 }
 0x3f9   : > { %v3193_v0 = vpop.eup %3192  ;;  %3210 = vrcp.f32 %v2431_v56 }
 0x3fa   : > { %v3195_v60 = vpop.eup %3194  ;;  %3212 = vrcp.f32 %v2434_v3  ;;  %2493 = vperm.xlu1 %3085, %v3193_v0   ;;  %2498 = vperm.xlu0 %3084, %v3191_v26  }
 0x3fb   : > { %v3197_v51 = vpop.eup %3196  ;;  %v2433_v32 = vadd.f32 1.0, %v3195_v60 }
 0x3fc   : > { %v3199_v44 = vpop.eup %3198  ;;  %v2436_v15 = vadd.f32 1.0, %v3197_v51 }
 0x3fd   : > { %v3201_v37 = vpop.eup %3200  ;;  %3214 = vrcp.f32 %v2433_v32 }
 0x3fe   : > { %3216 = vrcp.f32 %v2436_v15  ;;  %v2435_v47 = vadd.f32 1.0, %v3201_v37  ;;  %2508 = vperm.xlu0 %3084, %v3199_v44  }
 0x3ff   : > { %v3203_v54 = vpop.eup %3202 }
 0x400   : > { %v3205_v10 = vpop.eup %3204  ;;  %3218 = vrcp.f32 %v2435_v47  ;;  %2503 = vperm.xlu1 %3085, %v3203_v54   ;;  %v4804_v47 = vmax.f32 %v4425_v35, 0.0 }
 0x401   : > { %v3207_v2 = vpop.eup %3206 }
 0x402   : > { %v3209_v11 = vpop.eup %3208  ;;  %v2438_v52 = vadd.f32 1.0, %v3207_v2  ;;  %2518 = vperm.xlu0 %3084, %v3205_v10   ;;  %v4805_v10 = vmax.f32 %v4417_v16, 0.0  ;;  %v4806_v2 = vmax.f32 %v4419_v46, 0.0 }
 0x403   : > { %v3211_v58 = vpop.eup %3210  ;;  %v2437_v38 = vadd.f32 1.0, %v3209_v11 }
 0x404   : > { %v3213_v50 = vpop.eup %3212  ;;  %3220 = vrcp.f32 %v2438_v52  ;;  %2513 = vperm.xlu1 %3085, %v3211_v58   ;;  %v4808_v58 = vmax.f32 %v4445_v17, 0.0 }
 0x405   : > { %3222 = vrcp.f32 %v2437_v38 }
 0x406   : > { %2528 = vperm.xlu0 %3084, %v3213_v50   ;;  %v4809_v50 = vmax.f32 %v4437_v12, 0.0 }
 0x407   : > { %v3215_v25 = vpop.eup %3214 }
 0x408   : > { %v3217_v45 = vpop.eup %3216  ;;  %2523 = vperm.xlu1 %3085, %v3215_v25   ;;  %v4810_v25 = vmax.f32 %v4439_v49, 0.0 }
 0x40a   : > { %v3219_v56 = vpop.eup %3218  ;;  %2538 = vperm.xlu0 %3084, %v3217_v45  }
 0x40c   : > { %2533 = vperm.xlu1 %3085, %v3219_v56  }
 0x40e   : > { %v3221_v26 = vpop.eup %3220 }
 0x40f   : > { %v3223_v3 = vpop.eup %3222  ;;  %2548 = vperm.xlu0 %3084, %v3221_v26   ;;  %v4812_v26 = vmax.f32 %v4465_v7, 0.0 }
 0x410   : > { %2543 = vperm.xlu1 %3085, %v3223_v3  }
 0x470   : > { %v2479_v0 = vpop.permute.xlu1 %2478 }
 0x471   : > { %v2553_v60 = vmul.f32 %v2479_v0, %v2104_v55  ;;  %v2554_v51 = vmul.f32 %v2479_v0, %v2105_v34  ;;  %v2474_v32 = vpop.permute.xlu0 %2473  ;;  %v4813_v0 = vmax.f32 %v4457_v24, 0.0 }
 0x472   : > { %v2551_v44 = vmul.f32 %v2474_v32, %v2102_v39  ;;  %v2552_v15 = vmul.f32 %v2474_v32, %v2103_v40 }
 0x473   : > { %2585 = vst [vmem:[%s4597_s20 + $0x10] sm:$0xff] %v2553_v60  ;;  %2586 = vst [vmem:[%s4597_s20 + $0x18] sm:$0xff] %v2554_v51  ;;  %v4814_v60 = vmax.f32 %v4459_v48, 0.0 }
 0x474   : > { %2583 = vst [vmem:[%s4597_s20] sm:$0xff] %v2551_v44  ;;  %2584 = vst [vmem:[%s4597_s20 + $0x8] sm:$0xff] %v2552_v15  ;;  %v4815_v44 = vmax.f32 %v4482_v43, 0.0  ;;  %v4816_v15 = vmax.f32 %v4485_v22, 0.0 }
 0x475   : > { %v2484_v53 = vpop.permute.xlu1 %2483  ;;  %v2489_v55 = vpop.permute.xlu0 %2488 }
 0x476   : > { %v2555_v19 = vmul.f32 %v2484_v53, %v2106_v29  ;;  %v2556_v21 = vmul.f32 %v2484_v53, %v2107_v57  ;;  %v2557_v1 = vmul.f32 %v2489_v55, %v2108_v63  ;;  %v2558_v39 = vmul.f32 %v2489_v55, %v2109_v8 }
 0x477   : > { %v4799_v63 = vmax.f32 %v4402_v18, 0.0  ;;  %v4803_v18 = vmax.f32 %v4422_v27, 0.0  ;;  %v4807_v27 = vmax.f32 %v4442_v5, 0.0  ;;  %v4811_v5 = vmax.f32 %v4462_v36, 0.0 }
 0x478   : > { %2587 = vst [vmem:[%s4597_s20 + $0x20] sm:$0xff] %v2555_v19  ;;  %2588 = vst [vmem:[%s4597_s20 + $0x28] sm:$0xff] %v2556_v21  ;;  %v4817_v55 = vmax.f32 %v4477_v23, 0.0  ;;  %v4818_v19 = vmax.f32 %v4479_v33, 0.0 }
 0x479   : > { %2589 = vst [vmem:[%s4597_s20 + $0x30] sm:$0xff] %v2557_v1  ;;  %2590 = vst [vmem:[%s4597_s20 + $0x38] sm:$0xff] %v2558_v39  ;;  %v2494_v40 = vpop.permute.xlu1 %2493  ;;  %v2499_v34 = vpop.permute.xlu0 %2498 }
 0x47a   : > { %v2559_v28 = vmul.f32 %v2494_v40, %v2110_v20  ;;  %v2560_v14 = vmul.f32 %v2494_v40, %v2111_v6  ;;  %v2561_v29 = vmul.f32 %v2499_v34, %v2112_v42  ;;  %v2562_v57 = vmul.f32 %v2499_v34, %v4798_v30 }
 0x47c   : > { %2591 = vst [vmem:[%s4597_s20 + $0x40] sm:$0xff] %v2559_v28  ;;  %2592 = vst [vmem:[%s4597_s20 + $0x48] sm:$0xff] %v2560_v14 }
 0x47d   : > { %2593 = vst [vmem:[%s4597_s20 + $0x50] sm:$0xff] %v2561_v29  ;;  %2594 = vst [vmem:[%s4597_s20 + $0x58] sm:$0xff] %v2562_v57  ;;  %v2509_v41 = vpop.permute.xlu0 %2508 }
 0x47e   : > { %v2565_v8 = vmul.f32 %v2509_v41, %v4799_v63  ;;  %v2566_v61 = vmul.f32 %v2509_v41, %v4800_v4 }
 0x47f   : > { %v2504_v20 = vpop.permute.xlu1 %2503 }
 0x480   : > { %v2563_v6 = vmul.f32 %v2504_v20, %v4801_v62  ;;  %v2564_v42 = vmul.f32 %v2504_v20, %v4802_v59  ;;  %2597 = vst [vmem:[%s4597_s20 + $0x70] sm:$0xff] %v2565_v8  ;;  %2598 = vst [vmem:[%s4597_s20 + $0x78] sm:$0xff] %v2566_v61 }
 0x481   : > { %v2519_v37 = vpop.permute.xlu0 %2518 }
 0x482   : > { %2595 = vst [vmem:[%s4597_s20 + $0x60] sm:$0xff] %v2563_v6  ;;  %2596 = vst [vmem:[%s4597_s20 + $0x68] sm:$0xff] %v2564_v42  ;;  %v2569_v9 = vmul.f32 %v2519_v37, %v4803_v18  ;;  %v2570_v54 = vmul.f32 %v2519_v37, %v4804_v47 }
 0x483   : > { %v2514_v13 = vpop.permute.xlu1 %2513 }
 0x484   : > { %v2567_v31 = vmul.f32 %v2514_v13, %v4805_v10  ;;  %v2568_v11 = vmul.f32 %v2514_v13, %v4806_v2  ;;  %2601 = vst [vmem:[%s4597_s20 + $0x90] sm:$0xff] %v2569_v9  ;;  %2602 = vst [vmem:[%s4597_s20 + $0x98] sm:$0xff] %v2570_v54 }
 0x485   : > { %v2529_v52 = vpop.permute.xlu0 %2528 }
 0x486   : > { %2599 = vst [vmem:[%s4597_s20 + $0x80] sm:$0xff] %v2567_v31  ;;  %2600 = vst [vmem:[%s4597_s20 + $0x88] sm:$0xff] %v2568_v11  ;;  %v2573_v35 = vmul.f32 %v2529_v52, %v4807_v27  ;;  %v2574_v38 = vmul.f32 %v2529_v52, %v4808_v58 }
 0x487   : > { %v2524_v16 = vpop.permute.xlu1 %2523 }
 0x488   : > { %v2571_v46 = vmul.f32 %v2524_v16, %v4809_v50  ;;  %v2572_v45 = vmul.f32 %v2524_v16, %v4810_v25  ;;  %2605 = vst [vmem:[%s4597_s20 + $0xb0] sm:$0xff] %v2573_v35  ;;  %2606 = vst [vmem:[%s4597_s20 + $0xb8] sm:$0xff] %v2574_v38 }
 0x489   : > { %v2539_v56 = vpop.permute.xlu0 %2538 }
 0x48a   : > { %2603 = vst [vmem:[%s4597_s20 + $0xa0] sm:$0xff] %v2571_v46  ;;  %2604 = vst [vmem:[%s4597_s20 + $0xa8] sm:$0xff] %v2572_v45  ;;  %v2577_v17 = vmul.f32 %v2539_v56, %v4811_v5  ;;  %v2578_v3 = vmul.f32 %v2539_v56, %v4812_v26 }
 0x48b   : > { %v2534_v12 = vpop.permute.xlu1 %2533 }
 0x48c   : > { %v2575_v49 = vmul.f32 %v2534_v12, %v4813_v0  ;;  %v2576_v51 = vmul.f32 %v2534_v12, %v4814_v60  ;;  %2609 = vst [vmem:[%s4597_s20 + $0xd0] sm:$0xff] %v2577_v17  ;;  %2610 = vst [vmem:[%s4597_s20 + $0xd8] sm:$0xff] %v2578_v3 }
 0x48e   : > { %2607 = vst [vmem:[%s4597_s20 + $0xc0] sm:$0xff] %v2575_v49  ;;  %2608 = vst [vmem:[%s4597_s20 + $0xc8] sm:$0xff] %v2576_v51  ;;  %v2549_v36 = vpop.permute.xlu0 %2548 }
 0x48f   : > { %v2544_v32 = vpop.permute.xlu1 %2543  ;;  %v2581_v7 = vmul.f32 %v2549_v36, %v4815_v44  ;;  %v2582_v53 = vmul.f32 %v2549_v36, %v4816_v15 }
 0x490   : > { %v2579_v24 = vmul.f32 %v2544_v32, %v4817_v55  ;;  %v2580_v21 = vmul.f32 %v2544_v32, %v4818_v19 }
 0x491   : > { %2613 = vst [vmem:[%s4597_s20 + $0xf0] sm:$0xff] %v2581_v7  ;;  %2614 = vst [vmem:[%s4597_s20 + $0xf8] sm:$0xff] %v2582_v53 }
 0x492   : > { %2611 = vst [vmem:[%s4597_s20 + $0xe0] sm:$0xff] %v2579_v24  ;;  %2612 = vst [vmem:[%s4597_s20 + $0xe8] sm:$0xff] %v2580_v21 }
 0x493 PF: > { %s15_s18 = sadd.s32 1, %s3230_s18  }
 0x494   : > { %p12_p4 = scmp.ge.s32.totalorder %s15_s18, 4  }
 0x496   :  { %14 = sbr.rel (!%p12_p4) target bundleno = 1 (0x1), region = 70 }

</bundles_post_ra>
